<compile_context>
chip_gen: v5e
topology: v5e:2x2
jax: 0.10.0
libtpu: 0.0.40
codegen_flags: <defaults>
</compile_context>

<pallas_src>
import jax
import jax.numpy as jnp
from jax.experimental import pallas as pl
from jax.experimental.pallas import tpu as pltpu

B = 8            # batch
D = 768          # hidden size of roberta features
H = D // 2       # domain head hidden (768 -> 384 -> 2)
NUM_CLASSES = 2  # binary sentiment / binary domain
VOCAB = 512      # synthetic vocab size for prompt logits
LANE = 128       # lane-dense width of the packed [loss, acc] output row


# ---------------------------------------------------------------------------
# Single fused kernel: domain-head MLP (both domains), verbalizer softmax/log,
# task CE, domain CEs (margin form), accuracy.
# ---------------------------------------------------------------------------
def fused_adv_kernel(verb_ref,                     # SMEM (2,) int32 (scalar prefetch)
                     s_ref, t_ref,                 # (B, D) f32 source / target features
                     plog_ref,                     # (B, V) f32 prompt logits (source)
                     labels_ref,                   # (B, 1) int32
                     w1_ref, b1_ref,               # (D, H) bf16, (1, H) f32
                     wd_ref, bd_ref,               # (H, 1) f32, (1, 1) f32 (margin column)
                     out_ref):                     # (1, 128) f32: lane0=loss, lane1=acc
    b = plog_ref.shape[0]

    w1 = w1_ref[...]
    b1 = b1_ref[...]
    wd = wd_ref[...]
    bd = bd_ref[...]                                  # (1, 1), broadcasts

    # ---- domain head (ReverseLayerF is identity in forward) -----------------
    # bf16 MXU inputs, f32 accumulate; bias-add / ReLU in f32.
    h_s = jnp.maximum(
        jnp.dot(s_ref[...].astype(jnp.bfloat16), w1,
                preferred_element_type=jnp.float32) + b1, 0.0)        # (B, H)
    h_t = jnp.maximum(
        jnp.dot(t_ref[...].astype(jnp.bfloat16), w1,
                preferred_element_type=jnp.float32) + b1, 0.0)        # (B, H)

    # margin m = logit(class1) - logit(class0)
    m_s = jnp.dot(h_s, wd, preferred_element_type=jnp.float32) + bd   # (B, 1)
    m_t = jnp.dot(h_t, wd, preferred_element_type=jnp.float32) + bd   # (B, 1)

    # CE(dom_s, zeros) = softplus(m_s) ; CE(dom_t, ones) = softplus(-m_t)
    def softplus(x):
        return jnp.maximum(x, 0.0) + jnp.log(1.0 + jnp.exp(-jnp.abs(x)))

    dom_loss = (jnp.sum(softplus(m_s), axis=0, keepdims=True)
                + jnp.sum(softplus(-m_t), axis=0, keepdims=True)) / b  # (1, 1)

    # ---- verbalizer gather via lane-iota mask + lane reduction ---------------
    plog = plog_ref[...]
    lane_v = jax.lax.broadcasted_iota(jnp.int32, plog.shape, 1)
    lw0 = jnp.sum(jnp.where(lane_v == verb_ref[0], plog, 0.0),
                  axis=-1, keepdims=True)             # (B, 1) logit of 'bad'
    lw1 = jnp.sum(jnp.where(lane_v == verb_ref[1], plog, 0.0),
                  axis=-1, keepdims=True)             # (B, 1) logit of 'good'

    # label_words_logits = log(softmax([lw0, lw1]) + 1e-15)   (torch semantics)
    lmax = jnp.maximum(lw0, lw1)
    e0 = jnp.exp(lw0 - lmax)
    e1 = jnp.exp(lw1 - lmax)
    inv_den = 1.0 / (e0 + e1)      # exact division (tolerance over EUP approx)
    z0 = jnp.log(e0 * inv_den + 1e-15)
    z1 = jnp.log(e1 * inv_den + 1e-15)

    # ---- task CE (CrossEntropyLoss re-applies log_softmax) + accuracy --------
    labels = labels_ref[...]                          # (B, 1) int32
    is1 = labels == 1
    is1f = is1.astype(jnp.float32)
    zmax = jnp.maximum(z0, z1)
    lse_z = jnp.log(jnp.exp(z0 - zmax) + jnp.exp(z1 - zmax)) + zmax
    picked = jnp.where(is1, z1, z0)
    task_ce = jnp.sum(-picked + lse_z, axis=0, keepdims=True) / b      # (1, 1)

    pred1 = z1 > z0                                   # strict '>' == torch argmax tie-break
    correct = jnp.where(pred1, is1f, 1.0 - is1f)      # (B, 1)
    acc = jnp.sum(correct, axis=0, keepdims=True) / b * 100.0          # (1, 1)

    total = task_ce + dom_loss                        # (1, 1)

    # pack [loss, acc] into one lane-dense output row
    lane_o = jax.lax.broadcasted_iota(jnp.int32, out_ref.shape, 1)
    out_ref[...] = (jnp.where(lane_o == 0, total, 0.0)
                    + jnp.where(lane_o == 1, acc, 0.0))


# ---------------------------------------------------------------------------
# One-time parameter prep (NOT in the per-step path):
#   * W1 cast to bf16 once
#   * 2-class second Linear collapsed to a margin column
# ---------------------------------------------------------------------------
def prep_domain_head_params(w1, b1, w2, b2):
    w1_bf = w1.astype(jnp.bfloat16)                        # (D, H) bf16
    b1_f = b1.reshape(1, -1).astype(jnp.float32)           # (1, H)
    w_diff = (w2[:, 1] - w2[:, 0]).reshape(-1, 1).astype(jnp.float32)   # (H, 1)
    b_diff = (b2.reshape(-1)[1] - b2.reshape(-1)[0]).reshape(1, 1).astype(jnp.float32)
    return (w1_bf, b1_f, w_diff, b_diff)


# ---------------------------------------------------------------------------
# Forward wrapper (AdvModel.forward, epoch <= epochs // 2 branch)
# ---------------------------------------------------------------------------
@jax.jit
def adv_forward(cls_feat_s, cls_feat_t, prompt_logits_s, labels, verbalizer, params):
    w1_bf, b1_f, w_diff, b_diff = params
    b, d = cls_feat_s.shape
    v = prompt_logits_s.shape[1]
    hdim = w1_bf.shape[1]

    labels2d = labels.astype(jnp.int32).reshape(b, 1)
    verb = verbalizer.astype(jnp.int32)

    in_bytes = (2 * b * d * 4          # cls_feat_s, cls_feat_t (f32)
                + b * v * 4            # prompt logits
                + b * 4                # labels
                + d * hdim * 2         # W1 (bf16)
                + hdim * 4 + hdim * 4 + 4)   # b1, w_diff, b_diff
    cost = pl.CostEstimate(
        flops=2 * (2 * b) * d * hdim + 2 * (2 * b) * hdim,
        transcendentals=16 * b,
        bytes_accessed=in_bytes + LANE * 4)

    out = pl.pallas_call(
        fused_adv_kernel,
        out_shape=jax.ShapeDtypeStruct((1, LANE), jnp.float32),
        grid_spec=pltpu.PrefetchScalarGridSpec(
            num_scalar_prefetch=1,
            grid=(1,),
            in_specs=[
                pl.BlockSpec((b, d), lambda i, vb: (0, 0)),        # cls_feat_s (f32)
                pl.BlockSpec((b, d), lambda i, vb: (0, 0)),        # cls_feat_t (f32)
                pl.BlockSpec((b, v), lambda i, vb: (0, 0)),        # prompt logits
                pl.BlockSpec((b, 1), lambda i, vb: (0, 0)),        # labels
                pl.BlockSpec((d, hdim), lambda i, vb: (0, 0)),     # W1 (bf16, pre-cast)
                pl.BlockSpec((1, hdim), lambda i, vb: (0, 0)),     # b1
                pl.BlockSpec((hdim, 1), lambda i, vb: (0, 0)),     # w_diff
                pl.BlockSpec((1, 1), lambda i, vb: (0, 0)),        # b_diff
            ],
            out_specs=pl.BlockSpec((1, LANE), lambda i, vb: (0, 0)),
        ),
        compiler_params=pltpu.CompilerParams(
            dimension_semantics=("arbitrary",)),
        cost_estimate=cost,
    )(verb, cls_feat_s, cls_feat_t, prompt_logits_s, labels2d,
      w1_bf, b1_f, w_diff, b_diff)

    return out[0, 0], out[0, 1]


if __name__ == "__main__":
    key = jax.random.PRNGKey(0)
    k = jax.random.split(key, 8)

    # synthetic "feature extractor" outputs
    cls_feat_s = jax.random.normal(k[0], (B, D), jnp.float32)
    cls_feat_t = jax.random.normal(k[1], (B, D), jnp.float32)
    prompt_logits_s = jax.random.normal(k[2], (B, VOCAB), jnp.float32)
    labels = jax.random.randint(k[3], (B,), 0, NUM_CLASSES)
    verbalizer = jnp.array([17, 42], dtype=jnp.int32)  # token ids of 'bad', 'good'

    # guard the iota-mask gather assumptions (ids in-vocab and distinct)
    vb_host = [int(x) for x in verbalizer]
    assert all(0 <= t < VOCAB for t in vb_host) and len(set(vb_host)) == 2, vb_host

    # domain_head = Linear(768, 384) -> ReLU -> Linear(384, 2)
    # weights_init: normal(0, 0.02) on Linear weights; biases zero.
    w1 = 0.02 * jax.random.normal(k[4], (D, H), jnp.float32)
    b1 = jnp.zeros((1, H), jnp.float32)
    w2 = 0.02 * jax.random.normal(k[5], (H, NUM_CLASSES), jnp.float32)
    b2 = jnp.zeros((1, NUM_CLASSES), jnp.float32)

    params = prep_domain_head_params(w1, b1, w2, b2)   # once, outside the step

    loss, acc = adv_forward(cls_feat_s, cls_feat_t, prompt_logits_s,
                            labels, verbalizer, params)
    jax.block_until_ready((loss, acc))

    # pure-f32 reference (validates the bf16-matmul kernel path against the
    # original f32 model math)
    def ref():
        lw = jnp.take(prompt_logits_s, verbalizer, axis=1)
        z = jnp.log(jax.nn.softmax(lw, axis=-1) + 1e-15)
        task = jnp.mean(
            -jnp.take_along_axis(jax.nn.log_softmax(z, -1), labels[:, None], 1))

        h_s = jnp.maximum(cls_feat_s @ w1 + b1, 0.0)
        h_t = jnp.maximum(cls_feat_t @ w1 + b1, 0.0)
        dom_s = h_s @ w2 + b2
        dom_t = h_t @ w2 + b2
        dl = (jnp.mean(-jax.nn.log_softmax(dom_s, -1)[:, 0])
              + jnp.mean(-jax.nn.log_softmax(dom_t, -1)[:, 1]))
        racc = jnp.mean((jnp.argmax(z, -1) == labels).astype(jnp.float32)) * 100.0
        return task + dl, racc

    rloss, racc = ref()
    # loss ~ 2.1; 5e-3 abs (~0.25% rel) bounds the bf16-input rounding of the
    # first matmul while still catching real bugs.
    assert abs(float(loss) - float(rloss)) < 5e-3, (float(loss), float(rloss))
    assert abs(float(acc) - float(racc)) < 1e-3, (float(acc), float(racc))
    print("KERNEL_OK")
</pallas_src>

<mosaic_0001>
module attributes {stable_mosaic.version = 11 : i64} {
  func.func @fused_adv_kernel(%arg0: i32, %arg1: memref<2xi32, #tpu.memory_space<smem>>, %arg2: memref<8x768xf32, #tpu.memory_space<vmem>>, %arg3: memref<8x768xf32, #tpu.memory_space<vmem>>, %arg4: memref<8x512xf32, #tpu.memory_space<vmem>>, %arg5: memref<8x1xi32, #tpu.memory_space<vmem>>, %arg6: memref<768x384xbf16, #tpu.memory_space<vmem>>, %arg7: memref<1x384xf32, #tpu.memory_space<vmem>>, %arg8: memref<384x1xf32, #tpu.memory_space<vmem>>, %arg9: memref<1x1xf32, #tpu.memory_space<vmem>>, %arg10: memref<1x128xf32, #tpu.memory_space<vmem>>) attributes {dimension_semantics = [#tpu.dimension_semantics<arbitrary>], iteration_bounds = array<i64: 1>, scalar_prefetch = 1 : i64, scratch_operands = 0 : i64, tpu.core_type = #tpu.core_type<tc>, window_params = [{pipeline_mode = #tpu.pipeline_mode<synchronous>, transform_indices = @transform_0, window_bounds = array<i64: 8, 768>}, {pipeline_mode = #tpu.pipeline_mode<synchronous>, transform_indices = @transform_1, window_bounds = array<i64: 8, 768>}, {pipeline_mode = #tpu.pipeline_mode<synchronous>, transform_indices = @transform_2, window_bounds = array<i64: 8, 512>}, {pipeline_mode = #tpu.pipeline_mode<synchronous>, transform_indices = @transform_3, window_bounds = array<i64: 8, 1>}, {pipeline_mode = #tpu.pipeline_mode<synchronous>, transform_indices = @transform_4, window_bounds = array<i64: 768, 384>}, {pipeline_mode = #tpu.pipeline_mode<synchronous>, transform_indices = @transform_5, window_bounds = array<i64: 1, 384>}, {pipeline_mode = #tpu.pipeline_mode<synchronous>, transform_indices = @transform_6, window_bounds = array<i64: 384, 1>}, {pipeline_mode = #tpu.pipeline_mode<synchronous>, transform_indices = @transform_7, window_bounds = array<i64: 1, 1>}, {pipeline_mode = #tpu.pipeline_mode<synchronous>, transform_indices = @transform_8, window_bounds = array<i64: 1, 128>}]} {
    %c0 = arith.constant 0 : index
    %c0_0 = arith.constant 0 : index
    %0 = vector.load %arg6[%c0, %c0_0] : memref<768x384xbf16, #tpu.memory_space<vmem>>, vector<768x384xbf16>
    %c0_1 = arith.constant 0 : index
    %c0_2 = arith.constant 0 : index
    %1 = vector.load %arg7[%c0_1, %c0_2] : memref<1x384xf32, #tpu.memory_space<vmem>>, vector<1x384xf32>
    %c0_3 = arith.constant 0 : index
    %c0_4 = arith.constant 0 : index
    %2 = vector.load %arg8[%c0_3, %c0_4] : memref<384x1xf32, #tpu.memory_space<vmem>>, vector<384x1xf32>
    %c0_5 = arith.constant 0 : index
    %c0_6 = arith.constant 0 : index
    %3 = vector.load %arg9[%c0_5, %c0_6] : memref<1x1xf32, #tpu.memory_space<vmem>>, vector<1x1xf32>
    %c0_7 = arith.constant 0 : index
    %c0_8 = arith.constant 0 : index
    %4 = vector.load %arg2[%c0_7, %c0_8] : memref<8x768xf32, #tpu.memory_space<vmem>>, vector<8x768xf32>
    %5 = arith.truncf %4 : vector<8x768xf32> to vector<8x768xbf16>
    %cst = arith.constant dense<0.000000e+00> : vector<8x384xf32>
    %6 = tpu.matmul %5, %0, %cst {dimension_numbers = #tpu.dot_dimension_numbers<[1], [0], [0], [1], [0, 0, 1, 1], [], []>} : vector<8x768xbf16>, vector<768x384xbf16>, vector<8x384xf32> -> vector<8x384xf32>
    %7 = vector.broadcast %1 : vector<1x384xf32> to vector<8x384xf32>
    %8 = arith.addf %6, %7 : vector<8x384xf32>
    %cst_9 = arith.constant 0.000000e+00 : f32
    %9 = vector.broadcast %cst_9 : f32 to vector<8x384xf32>
    %10 = arith.maximumf %8, %9 : vector<8x384xf32>
    %c0_10 = arith.constant 0 : index
    %c0_11 = arith.constant 0 : index
    %11 = vector.load %arg3[%c0_10, %c0_11] : memref<8x768xf32, #tpu.memory_space<vmem>>, vector<8x768xf32>
    %12 = arith.truncf %11 : vector<8x768xf32> to vector<8x768xbf16>
    %cst_12 = arith.constant dense<0.000000e+00> : vector<8x384xf32>
    %13 = tpu.matmul %12, %0, %cst_12 {dimension_numbers = #tpu.dot_dimension_numbers<[1], [0], [0], [1], [0, 0, 1, 1], [], []>} : vector<8x768xbf16>, vector<768x384xbf16>, vector<8x384xf32> -> vector<8x384xf32>
    %14 = vector.broadcast %1 : vector<1x384xf32> to vector<8x384xf32>
    %15 = arith.addf %13, %14 : vector<8x384xf32>
    %cst_13 = arith.constant 0.000000e+00 : f32
    %16 = vector.broadcast %cst_13 : f32 to vector<8x384xf32>
    %17 = arith.maximumf %15, %16 : vector<8x384xf32>
    %cst_14 = arith.constant dense<0.000000e+00> : vector<8x1xf32>
    %18 = tpu.matmul %10, %2, %cst_14 {dimension_numbers = #tpu.dot_dimension_numbers<[1], [0], [0], [1], [0, 0, 1, 1], [], []>} : vector<8x384xf32>, vector<384x1xf32>, vector<8x1xf32> -> vector<8x1xf32>
    %19 = vector.broadcast %3 : vector<1x1xf32> to vector<8x1xf32>
    %20 = arith.addf %18, %19 : vector<8x1xf32>
    %cst_15 = arith.constant dense<0.000000e+00> : vector<8x1xf32>
    %21 = tpu.matmul %17, %2, %cst_15 {dimension_numbers = #tpu.dot_dimension_numbers<[1], [0], [0], [1], [0, 0, 1, 1], [], []>} : vector<8x384xf32>, vector<384x1xf32>, vector<8x1xf32> -> vector<8x1xf32>
    %22 = vector.broadcast %3 : vector<1x1xf32> to vector<8x1xf32>
    %23 = arith.addf %21, %22 : vector<8x1xf32>
    %cst_16 = arith.constant 0.000000e+00 : f32
    %24 = vector.broadcast %cst_16 : f32 to vector<8x1xf32>
    %25 = arith.maximumf %20, %24 : vector<8x1xf32>
    %26 = math.absf %20 : vector<8x1xf32>
    %cst_17 = arith.constant 0.000000e+00 : f32
    %27 = vector.broadcast %cst_17 : f32 to vector<8x1xf32>
    %28 = arith.subf %27, %26 : vector<8x1xf32>
    %29 = math.exp %28 : vector<8x1xf32>
    %cst_18 = arith.constant 1.000000e+00 : f32
    %30 = vector.broadcast %cst_18 : f32 to vector<8x1xf32>
    %31 = arith.addf %30, %29 : vector<8x1xf32>
    %32 = math.log %31 : vector<8x1xf32>
    %33 = arith.addf %25, %32 : vector<8x1xf32>
    %cst_19 = arith.constant dense<0.000000e+00> : vector<1xf32>
    %34 = vector.multi_reduction <add>, %33, %cst_19 [0] : vector<8x1xf32> to vector<1xf32>
    %35 = vector.shape_cast %34 : vector<1xf32> to vector<1x1xf32>
    %cst_20 = arith.constant 0.000000e+00 : f32
    %36 = vector.broadcast %cst_20 : f32 to vector<8x1xf32>
    %37 = arith.subf %36, %23 : vector<8x1xf32>
    %cst_21 = arith.constant 0.000000e+00 : f32
    %38 = vector.broadcast %cst_21 : f32 to vector<8x1xf32>
    %39 = arith.maximumf %37, %38 : vector<8x1xf32>
    %40 = math.absf %37 : vector<8x1xf32>
    %cst_22 = arith.constant 0.000000e+00 : f32
    %41 = vector.broadcast %cst_22 : f32 to vector<8x1xf32>
    %42 = arith.subf %41, %40 : vector<8x1xf32>
    %43 = math.exp %42 : vector<8x1xf32>
    %cst_23 = arith.constant 1.000000e+00 : f32
    %44 = vector.broadcast %cst_23 : f32 to vector<8x1xf32>
    %45 = arith.addf %44, %43 : vector<8x1xf32>
    %46 = math.log %45 : vector<8x1xf32>
    %47 = arith.addf %39, %46 : vector<8x1xf32>
    %cst_24 = arith.constant dense<0.000000e+00> : vector<1xf32>
    %48 = vector.multi_reduction <add>, %47, %cst_24 [0] : vector<8x1xf32> to vector<1xf32>
    %49 = vector.shape_cast %48 : vector<1xf32> to vector<1x1xf32>
    %50 = arith.addf %35, %49 : vector<1x1xf32>
    %cst_25 = arith.constant 8.000000e+00 : f32
    %51 = vector.broadcast %cst_25 : f32 to vector<1x1xf32>
    %52 = arith.divf %50, %51 : vector<1x1xf32>
    %c0_26 = arith.constant 0 : index
    %c0_27 = arith.constant 0 : index
    %53 = vector.load %arg4[%c0_26, %c0_27] : memref<8x512xf32, #tpu.memory_space<vmem>>, vector<8x512xf32>
    %54 = tpu.iota {dimensions = array<i32: 1>} : vector<8x512xi32>
    %c0_28 = arith.constant 0 : index
    %55 = memref.load %arg1[%c0_28] : memref<2xi32, #tpu.memory_space<smem>>
    %56 = vector.broadcast %55 : i32 to vector<8x512xi32>
    %57 = arith.cmpi eq, %54, %56 : vector<8x512xi32>
    %cst_29 = arith.constant 0.000000e+00 : f32
    %58 = vector.broadcast %cst_29 : f32 to vector<8x512xf32>
    %59 = arith.select %57, %53, %58 : vector<8x512xi1>, vector<8x512xf32>
    %cst_30 = arith.constant dense<0.000000e+00> : vector<8xf32>
    %60 = vector.multi_reduction <add>, %59, %cst_30 [1] : vector<8x512xf32> to vector<8xf32>
    %61 = vector.shape_cast %60 : vector<8xf32> to vector<8x1xf32>
    %c1 = arith.constant 1 : index
    %62 = memref.load %arg1[%c1] : memref<2xi32, #tpu.memory_space<smem>>
    %63 = vector.broadcast %62 : i32 to vector<8x512xi32>
    %64 = arith.cmpi eq, %54, %63 : vector<8x512xi32>
    %cst_31 = arith.constant 0.000000e+00 : f32
    %65 = vector.broadcast %cst_31 : f32 to vector<8x512xf32>
    %66 = arith.select %64, %53, %65 : vector<8x512xi1>, vector<8x512xf32>
    %cst_32 = arith.constant dense<0.000000e+00> : vector<8xf32>
    %67 = vector.multi_reduction <add>, %66, %cst_32 [1] : vector<8x512xf32> to vector<8xf32>
    %68 = vector.shape_cast %67 : vector<8xf32> to vector<8x1xf32>
    %69 = arith.maximumf %61, %68 : vector<8x1xf32>
    %70 = arith.subf %61, %69 : vector<8x1xf32>
    %71 = math.exp %70 : vector<8x1xf32>
    %72 = arith.subf %68, %69 : vector<8x1xf32>
    %73 = math.exp %72 : vector<8x1xf32>
    %74 = arith.addf %71, %73 : vector<8x1xf32>
    %cst_33 = arith.constant 1.000000e+00 : f32
    %75 = vector.broadcast %cst_33 : f32 to vector<8x1xf32>
    %76 = arith.divf %75, %74 : vector<8x1xf32>
    %77 = arith.mulf %71, %76 : vector<8x1xf32>
    %cst_34 = arith.constant 1.000000e-15 : f32
    %78 = vector.broadcast %cst_34 : f32 to vector<8x1xf32>
    %79 = arith.addf %77, %78 : vector<8x1xf32>
    %80 = math.log %79 : vector<8x1xf32>
    %81 = arith.mulf %73, %76 : vector<8x1xf32>
    %cst_35 = arith.constant 1.000000e-15 : f32
    %82 = vector.broadcast %cst_35 : f32 to vector<8x1xf32>
    %83 = arith.addf %81, %82 : vector<8x1xf32>
    %84 = math.log %83 : vector<8x1xf32>
    %c0_36 = arith.constant 0 : index
    %c0_37 = arith.constant 0 : index
    %85 = vector.load %arg5[%c0_36, %c0_37] : memref<8x1xi32, #tpu.memory_space<vmem>>, vector<8x1xi32>
    %c1_i32 = arith.constant 1 : i32
    %86 = vector.broadcast %c1_i32 : i32 to vector<8x1xi32>
    %87 = arith.cmpi eq, %85, %86 : vector<8x1xi32>
    %88 = arith.extui %87 : vector<8x1xi1> to vector<8x1xi32>
    %89 = arith.sitofp %88 : vector<8x1xi32> to vector<8x1xf32>
    %90 = arith.maximumf %80, %84 : vector<8x1xf32>
    %91 = arith.subf %80, %90 : vector<8x1xf32>
    %92 = math.exp %91 : vector<8x1xf32>
    %93 = arith.subf %84, %90 : vector<8x1xf32>
    %94 = math.exp %93 : vector<8x1xf32>
    %95 = arith.addf %92, %94 : vector<8x1xf32>
    %96 = math.log %95 : vector<8x1xf32>
    %97 = arith.addf %96, %90 : vector<8x1xf32>
    %98 = arith.select %87, %84, %80 : vector<8x1xi1>, vector<8x1xf32>
    %cst_38 = arith.constant 0.000000e+00 : f32
    %99 = vector.broadcast %cst_38 : f32 to vector<8x1xf32>
    %100 = arith.subf %99, %98 : vector<8x1xf32>
    %101 = arith.addf %100, %97 : vector<8x1xf32>
    %cst_39 = arith.constant dense<0.000000e+00> : vector<1xf32>
    %102 = vector.multi_reduction <add>, %101, %cst_39 [0] : vector<8x1xf32> to vector<1xf32>
    %103 = vector.shape_cast %102 : vector<1xf32> to vector<1x1xf32>
    %cst_40 = arith.constant 8.000000e+00 : f32
    %104 = vector.broadcast %cst_40 : f32 to vector<1x1xf32>
    %105 = arith.divf %103, %104 : vector<1x1xf32>
    %106 = arith.cmpf ogt, %84, %80 : vector<8x1xf32>
    %cst_41 = arith.constant 1.000000e+00 : f32
    %107 = vector.broadcast %cst_41 : f32 to vector<8x1xf32>
    %108 = arith.subf %107, %89 : vector<8x1xf32>
    %109 = arith.select %106, %89, %108 : vector<8x1xi1>, vector<8x1xf32>
    %cst_42 = arith.constant dense<0.000000e+00> : vector<1xf32>
    %110 = vector.multi_reduction <add>, %109, %cst_42 [0] : vector<8x1xf32> to vector<1xf32>
    %111 = vector.shape_cast %110 : vector<1xf32> to vector<1x1xf32>
    %cst_43 = arith.constant 8.000000e+00 : f32
    %112 = vector.broadcast %cst_43 : f32 to vector<1x1xf32>
    %113 = arith.divf %111, %112 : vector<1x1xf32>
    %cst_44 = arith.constant 1.000000e+02 : f32
    %114 = vector.broadcast %cst_44 : f32 to vector<1x1xf32>
    %115 = arith.mulf %113, %114 : vector<1x1xf32>
    %116 = arith.addf %105, %52 : vector<1x1xf32>
    %117 = tpu.iota {dimensions = array<i32: 1>} : vector<1x128xi32>
    %c0_i32 = arith.constant 0 : i32
    %118 = vector.broadcast %c0_i32 : i32 to vector<1x128xi32>
    %119 = arith.cmpi eq, %117, %118 : vector<1x128xi32>
    %cst_45 = arith.constant 0.000000e+00 : f32
    %120 = vector.shape_cast %116 : vector<1x1xf32> to vector<1x1xf32>
    %121 = vector.broadcast %120 : vector<1x1xf32> to vector<1x128xf32>
    %122 = vector.broadcast %cst_45 : f32 to vector<1x128xf32>
    %123 = arith.select %119, %121, %122 : vector<1x128xi1>, vector<1x128xf32>
    %c1_i32_46 = arith.constant 1 : i32
    %124 = vector.broadcast %c1_i32_46 : i32 to vector<1x128xi32>
    %125 = arith.cmpi eq, %117, %124 : vector<1x128xi32>
    %cst_47 = arith.constant 0.000000e+00 : f32
    %126 = vector.shape_cast %115 : vector<1x1xf32> to vector<1x1xf32>
    %127 = vector.broadcast %126 : vector<1x1xf32> to vector<1x128xf32>
    %128 = vector.broadcast %cst_47 : f32 to vector<1x128xf32>
    %129 = arith.select %125, %127, %128 : vector<1x128xi1>, vector<1x128xf32>
    %130 = arith.addf %123, %129 : vector<1x128xf32>
    %c0_48 = arith.constant 0 : index
    %c0_49 = arith.constant 0 : index
    %131 = vector.load %arg10[%c0_48, %c0_49] : memref<1x128xf32, #tpu.memory_space<vmem>>, vector<1x128xf32>
    tpu.vector_store %arg10[%c0_48, %c0_49], %130 {strides = array<i32>} : memref<1x128xf32, #tpu.memory_space<vmem>>, vector<1x128xf32>,
    return
  }
  func.func @transform_0(%arg0: i32, %arg1: memref<2xi32, #tpu.memory_space<smem>>) -> (i32, i32) {
    %c0_i32 = arith.constant 0 : i32
    %c0_i32_0 = arith.constant 0 : i32
    %c0_i32_1 = arith.constant 0 : i32
    return %c0_i32, %c0_i32_0 : i32, i32
  }
  func.func @transform_1(%arg0: i32, %arg1: memref<2xi32, #tpu.memory_space<smem>>) -> (i32, i32) {
    %c0_i32 = arith.constant 0 : i32
    %c0_i32_0 = arith.constant 0 : i32
    %c0_i32_1 = arith.constant 0 : i32
    return %c0_i32, %c0_i32_0 : i32, i32
  }
  func.func @transform_2(%arg0: i32, %arg1: memref<2xi32, #tpu.memory_space<smem>>) -> (i32, i32) {
    %c0_i32 = arith.constant 0 : i32
    %c0_i32_0 = arith.constant 0 : i32
    %c0_i32_1 = arith.constant 0 : i32
    return %c0_i32, %c0_i32_0 : i32, i32
  }
  func.func @transform_3(%arg0: i32, %arg1: memref<2xi32, #tpu.memory_space<smem>>) -> (i32, i32) {
    %c0_i32 = arith.constant 0 : i32
    %c0_i32_0 = arith.constant 0 : i32
    %c0_i32_1 = arith.constant 0 : i32
    return %c0_i32, %c0_i32_0 : i32, i32
  }
  func.func @transform_4(%arg0: i32, %arg1: memref<2xi32, #tpu.memory_space<smem>>) -> (i32, i32) {
    %c0_i32 = arith.constant 0 : i32
    %c0_i32_0 = arith.constant 0 : i32
    %c0_i32_1 = arith.constant 0 : i32
    return %c0_i32, %c0_i32_0 : i32, i32
  }
  func.func @transform_5(%arg0: i32, %arg1: memref<2xi32, #tpu.memory_space<smem>>) -> (i32, i32) {
    %c0_i32 = arith.constant 0 : i32
    %c0_i32_0 = arith.constant 0 : i32
    %c0_i32_1 = arith.constant 0 : i32
    return %c0_i32, %c0_i32_0 : i32, i32
  }
  func.func @transform_6(%arg0: i32, %arg1: memref<2xi32, #tpu.memory_space<smem>>) -> (i32, i32) {
    %c0_i32 = arith.constant 0 : i32
    %c0_i32_0 = arith.constant 0 : i32
    %c0_i32_1 = arith.constant 0 : i32
    return %c0_i32, %c0_i32_0 : i32, i32
  }
  func.func @transform_7(%arg0: i32, %arg1: memref<2xi32, #tpu.memory_space<smem>>) -> (i32, i32) {
    %c0_i32 = arith.constant 0 : i32
    %c0_i32_0 = arith.constant 0 : i32
    %c0_i32_1 = arith.constant 0 : i32
    return %c0_i32, %c0_i32_0 : i32, i32
  }
  func.func @transform_8(%arg0: i32, %arg1: memref<2xi32, #tpu.memory_space<smem>>) -> (i32, i32) {
    %c0_i32 = arith.constant 0 : i32
    %c0_i32_0 = arith.constant 0 : i32
    %c0_i32_1 = arith.constant 0 : i32
    return %c0_i32, %c0_i32_0 : i32, i32
  }
}

</mosaic_0001>

<bundles_post_ra>
// kernel: adv_forward.1
= control target key start
LH: loop header
LB: loop body
LE: loop exit
PB: predicated region body
PF: predicated region fallthrough
CT: control target
= control target key end

     0   :  { %s2665_s14 = smov [#allocation3]   ;;  %s3816_s0 = inlined_call_operand.vmem [shape: s32[2], index: 0, kind: input, shape index: {}]   ;;  %s3817_s1 = inlined_call_operand.vmem [shape: f32[8,768], index: 1, kind: input, shape index: {}]   ;;  %s3818_s2 = inlined_call_operand.vmem [shape: f32[8,768], index: 2, kind: input, shape index: {}]   ;;  %s3819_s3 = inlined_call_operand.vmem [shape: f32[8,512], index: 3, kind: input, shape index: {}]   ;;  %s3820_s4 = inlined_call_operand.vmem [shape: s32[8,1], index: 4, kind: input, shape index: {}]   ;;  %s3821_s5 = inlined_call_operand.hbm [shape: bf16[768,384], index: 5, kind: input, shape index: {}]   ;;  %s3822_s6 = inlined_call_operand.vmem [shape: f32[1,384], index: 6, kind: input, shape index: {}]   ;;  %s3823_s7 = inlined_call_operand.vmem [shape: f32[384,1], index: 7, kind: input, shape index: {}]   ;;  %s3824_s9 = inlined_call_operand.vmem [shape: f32[1,128], index: 9, kind: output, shape index: {}]   ;;  %s3825_s8 = inlined_call_operand.<no memory space> [shape: f32[1,1], index: 8, kind: input, shape index: {}]  }
   0x1   :  { %s15_s11 = sshll.u32 %s3816_s0, 4  ;;  %v19_v0 = vstv %s3825_s8  ;;  %s16_s11 = int_to_ptr.vmem [resolvable:$true] %s15_s11 }
   0x2   :  { %20 = vst [vmem:[#allocation4] sm:$0x1] %v19_v0  ;;  %18 = dma.vmem_to_smem %s16_s11, 16, %s2665_s14, [#allocation2] }
   0x3   :  { %2661 = dma.done.wait [#allocation2], 16 }
   0x4   :  { %2662 = vsyncadd [#allocation2], 4294967280 }
   0x5   :  { %23 = sfence }
   0x6   :  { %24 = vsyncpa [#allocation6], 0  ;;  %s37_s17 = sshll.u32 %s3821_s5, 4  ;;  %s2666_s18 = smov [#allocation5]   ;;  %s38_s17 = int_to_ptr.hbm [resolvable:$true] %s37_s17 }
   0x7   :  { %s39_s19 = sshll.u32 %s2666_s18, 4  ;;  %s2667_s0 = smov 192   ;;  %s40_s19 = int_to_ptr.vmem [resolvable:$true] %s39_s19 }
   0x8   :  { %s2668_s20 = smov 12  }
   0x9   :  { %45 = dma.hbm_to_vmem [thread:$0]  %s38_s17, 18432, %s40_s19, [#allocation6], %s2667_s0, %s2667_s0, %s2668_s20  }
   0xa   :  { %2663 = dma.done.wait [#allocation6], 18432  }
   0xb   :  { %2664 = vsyncadd [#allocation6], 4294948864  ;;  %v1953_v1 = vld [vmem:[#allocation5 + $0xa8] sm:$0xf]  ;;  %v2467_v2 = vld [vmem:[#allocation5 + $0xb0] sm:$0xf0] }
   0xc   :  { %v2049_v3 = vld [vmem:[#allocation5 + $0x168] sm:$0xf]  ;;  %v2731_v4 = vor.u32 %v2467_v2, %v1953_v1  ;;  %v2491_v5 = vld [vmem:[#allocation5 + $0x170] sm:$0xf0]  ;;  %v1941_v12 = vld [vmem:[#allocation5 + $0x90] sm:$0xf] }
   0xd   :  { %v2145_v6 = vld [vmem:[#allocation5 + $0x228] sm:$0xf]  ;;  %v2515_v7 = vld [vmem:[#allocation5 + $0x230] sm:$0xf0]  ;;  %v2733_v8 = vor.u32 %v2491_v5, %v2049_v3  ;;  %v2464_v14 = vld [vmem:[#allocation5 + $0x98] sm:$0xf0] }
   0xe   :  { %v2735_v9 = vor.u32 %v2515_v7, %v2145_v6  ;;  %v2241_v10 = vld [vmem:[#allocation5 + $0x2e8] sm:$0xf]  ;;  %v2539_v11 = vld [vmem:[#allocation5 + $0x2f0] sm:$0xf0]  ;;  %1085 = vmatpush.bf16.msra.mxu0 %v2731_v4  ;;  %v2037_v15 = vld [vmem:[#allocation5 + $0x150] sm:$0xf]  ;;  %v2742_v17 = vor.u32 %v2464_v14, %v1941_v12 }
   0xf   :  { %v2738_v13 = vor.u32 %v2539_v11, %v2241_v10  ;;  %v2488_v16 = vld [vmem:[#allocation5 + $0x158] sm:$0xf0]  ;;  %1098 = vmatpush.bf16.msra.mxu1 %v2733_v8  ;;  %v2133_v19 = vld [vmem:[#allocation5 + $0x210] sm:$0xf]  ;;  %v1929_v24 = vld [vmem:[#allocation5 + $0x78] sm:$0xf] }
  0x10   :  { %1111 = vmatpush.bf16.msra.mxu2 %v2735_v9  ;;  %v2744_v18 = vor.u32 %v2488_v16, %v2037_v15  ;;  %v2512_v20 = vld [vmem:[#allocation5 + $0x218] sm:$0xf0]  ;;  %v2229_v21 = vld [vmem:[#allocation5 + $0x2d0] sm:$0xf]  ;;  %v2461_v25 = vld [vmem:[#allocation5 + $0x80] sm:$0xf0] }
  0x11   :  { %1124 = vmatpush.bf16.msra.mxu3 %v2738_v13  ;;  %v2747_v22 = vor.u32 %v2512_v20, %v2133_v19  ;;  %v2536_v23 = vld [vmem:[#allocation5 + $0x2d8] sm:$0xf0]  ;;  %v2025_v27 = vld [vmem:[#allocation5 + $0x138] sm:$0xf]  ;;  %v2485_v28 = vld [vmem:[#allocation5 + $0x140] sm:$0xf0]  ;;  %v2752_v30 = vor.u32 %v2461_v25, %v1929_v24 }
  0x12   :  { %v2749_v26 = vor.u32 %v2536_v23, %v2229_v21  ;;  %v2121_v29 = vld [vmem:[#allocation5 + $0x1f8] sm:$0xf]  ;;  %1086 = vmatpush.bf16.msra.mxu0 %v2742_v17  ;;  %v2509_v31 = vld [vmem:[#allocation5 + $0x200] sm:$0xf0]  ;;  %v2756_v34 = vor.u32 %v2485_v28, %v2025_v27  ;;  %v1917_v36 = vld [vmem:[#allocation5 + $0x60] sm:$0xf] }
  0x13   :  { %v2217_v32 = vld [vmem:[#allocation5 + $0x2b8] sm:$0xf]  ;;  %v2533_v33 = vld [vmem:[#allocation5 + $0x2c0] sm:$0xf0]  ;;  %1099 = vmatpush.bf16.msra.mxu1 %v2744_v18  ;;  %v2758_v35 = vor.u32 %v2509_v31, %v2121_v29  ;;  %v2458_v37 = vld [vmem:[#allocation5 + $0x68] sm:$0xf0] }
  0x14   :  { %1112 = vmatpush.bf16.msra.mxu2 %v2747_v22  ;;  %v2013_v38 = vld [vmem:[#allocation5 + $0x120] sm:$0xf]  ;;  %v2761_v39 = vor.u32 %v2533_v33, %v2217_v32  ;;  %v2482_v40 = vld [vmem:[#allocation5 + $0x128] sm:$0xf0]  ;;  %v2764_v45 = vor.u32 %v2458_v37, %v1917_v36  ;;  %v1905_v48 = vld [vmem:[#allocation5 + $0x48] sm:$0xf] }
  0x15   :  { %1125 = vmatpush.bf16.msra.mxu3 %v2749_v26  ;;  %v2109_v41 = vld [vmem:[#allocation5 + $0x1e0] sm:$0xf]  ;;  %v2506_v42 = vld [vmem:[#allocation5 + $0x1e8] sm:$0xf0]  ;;  %v2768_v46 = vor.u32 %v2482_v40, %v2013_v38  ;;  %v2455_v49 = vld [vmem:[#allocation5 + $0x50] sm:$0xf0] }
  0x16   :  { %v2205_v43 = vld [vmem:[#allocation5 + $0x2a0] sm:$0xf]  ;;  %v2530_v44 = vld [vmem:[#allocation5 + $0x2a8] sm:$0xf0]  ;;  %1087 = vmatpush.bf16.msra.mxu0 %v2752_v30  ;;  %v2770_v47 = vor.u32 %v2506_v42, %v2109_v41  ;;  %v2001_v50 = vld [vmem:[#allocation5 + $0x108] sm:$0xf]  ;;  %v2776_v57 = vor.u32 %v2455_v49, %v1905_v48 }
  0x17   :  { %1100 = vmatpush.bf16.msra.mxu1 %v2756_v34  ;;  %v2773_v51 = vor.u32 %v2530_v44, %v2205_v43  ;;  %v2479_v52 = vld [vmem:[#allocation5 + $0x110] sm:$0xf0]  ;;  %v2097_v53 = vld [vmem:[#allocation5 + $0x1c8] sm:$0xf]  ;;  %v1893_v60 = vld [vmem:[#allocation5 + $0x30] sm:$0xf] }
  0x18   :  { %1113 = vmatpush.bf16.msra.mxu2 %v2758_v35  ;;  %v2503_v54 = vld [vmem:[#allocation5 + $0x1d0] sm:$0xf0]  ;;  %v2193_v55 = vld [vmem:[#allocation5 + $0x288] sm:$0xf]  ;;  %v2780_v58 = vor.u32 %v2479_v52, %v2001_v50  ;;  %v2452_v61 = vld [vmem:[#allocation5 + $0x38] sm:$0xf0] }
  0x19   :  { %1126 = vmatpush.bf16.msra.mxu3 %v2761_v39  ;;  %v2527_v56 = vld [vmem:[#allocation5 + $0x290] sm:$0xf0]  ;;  %v2782_v59 = vor.u32 %v2503_v54, %v2097_v53  ;;  %v1989_v62 = vld [vmem:[#allocation5 + $0xf0] sm:$0xf]  ;;  %v2476_v0 = vld [vmem:[#allocation5 + $0xf8] sm:$0xf0]  ;;  %v2788_v6 = vor.u32 %v2452_v61, %v1893_v60 }
  0x1a   :  { %1088 = vmatpush.bf16.msra.mxu0 %v2764_v45  ;;  %v2785_v63 = vor.u32 %v2527_v56, %v2193_v55  ;;  %v2085_v1 = vld [vmem:[#allocation5 + $0x1b0] sm:$0xf]  ;;  %v2500_v2 = vld [vmem:[#allocation5 + $0x1b8] sm:$0xf0]  ;;  %v2792_v7 = vor.u32 %v2476_v0, %v1989_v62  ;;  %v1881_v11 = vld [vmem:[#allocation5 + $0x18] sm:$0xf] }
  0x1b   :  { %1101 = vmatpush.bf16.msra.mxu1 %v2768_v46  ;;  %3912 = vst [vmem:[#allocation9_spill] sm:$0xff] %v2782_v59  ;;  %v2181_v3 = vld [vmem:[#allocation5 + $0x270] sm:$0xf]  ;;  %v2524_v5 = vld [vmem:[#allocation5 + $0x278] sm:$0xf0]  ;;  %v2794_v10 = vor.u32 %v2500_v2, %v2085_v1  ;;  %vm1703_vm13 = vcmask 7168  }
  0x1c   :  { %1114 = vmatpush.bf16.msra.mxu2 %v2770_v47  ;;  %3913 = vst [vmem:[#allocation10_spill] sm:$0xff] %v2785_v63  ;;  %v2449_v12 = vld [vmem:[#allocation5 + $0x20] sm:$0xf0]  ;;  %v1977_v14 = vld [vmem:[#allocation5 + $0xd8] sm:$0xf]  ;;  %v2797_v15 = vor.u32 %v2524_v5, %v2181_v3 }
  0x1d   :  { %1127 = vmatpush.bf16.msra.mxu3 %v2773_v51  ;;  %3914 = vst [vmem:[#allocation11_spill] sm:$0xff] %v2794_v10  ;;  %v2473_v16 = vld [vmem:[#allocation5 + $0xe0] sm:$0xf0]  ;;  %v2073_v19 = vld [vmem:[#allocation5 + $0x198] sm:$0xf]  ;;  %v2800_v24 = vor.u32 %v2449_v12, %v1881_v11 }
  0x1e   :  { %1089 = vmatpush.bf16.msra.mxu0 %v2776_v57  ;;  %3915 = vst [vmem:[#allocation12_spill] sm:$0xff] %v2797_v15  ;;  %v2497_v20 = vld [vmem:[#allocation5 + $0x1a0] sm:$0xf0]  ;;  %v2169_v21 = vld [vmem:[#allocation5 + $0x258] sm:$0xf]  ;;  %v2804_v28 = vor.u32 %v2473_v16, %v1977_v14 }
  0x1f   :  { %1102 = vmatpush.bf16.msra.mxu1 %v2780_v58  ;;  %v2521_v23 = vld [vmem:[#allocation5 + $0x260] sm:$0xf0]  ;;  %v1869_v25 = vld [vmem:[#allocation5] sm:$0xf]  ;;  %v2446_v27 = vld [vmem:[#allocation5 + $0x8] sm:$0xf0]  ;;  %v2806_v29 = vor.u32 %v2497_v20, %v2073_v19 }
  0x20   :  { %1115 = vmatpush.bf16.msra.mxu2 %v2782_v59  ;;  %v1965_v31 = vld [vmem:[#allocation5 + $0xc0] sm:$0xf]  ;;  %v2470_v32 = vld [vmem:[#allocation5 + $0xc8] sm:$0xf0]  ;;  %v2809_v36 = vor.u32 %v2521_v23, %v2169_v21  ;;  %v2337_v41 = vld [vmem:[#allocation5 + $0x3a8] sm:$0xf]  ;;  %v2812_v44 = vor.u32 %v2446_v27, %v1869_v25 }
  0x21   :  { %1128 = vmatpush.bf16.msra.mxu3 %v2785_v63  ;;  %3916 = vst [vmem:[#allocation13_spill] sm:$0xff] %v2806_v29  ;;  %v2061_v33 = vld [vmem:[#allocation5 + $0x180] sm:$0xf]  ;;  %v2494_v37 = vld [vmem:[#allocation5 + $0x188] sm:$0xf0]  ;;  %v2816_v52 = vor.u32 %v2470_v32, %v1965_v31 }
  0x22   :  { %1090 = vmatpush.bf16.msra.mxu0 %v2788_v6  ;;  %3917 = vst [vmem:[#allocation14_spill] sm:$0xff] %v2809_v36  ;;  %v2157_v38 = vld [vmem:[#allocation5 + $0x240] sm:$0xf]  ;;  %v2518_v40 = vld [vmem:[#allocation5 + $0x248] sm:$0xf0]  ;;  %v2818_v53 = vor.u32 %v2494_v37, %v2061_v33 }
  0x23   :  { %1103 = vmatpush.bf16.msra.mxu1 %v2792_v7  ;;  %v2563_v42 = vld [vmem:[#allocation5 + $0x3b0] sm:$0xf0]  ;;  %v2433_v43 = vld [vmem:[#allocation5 + $0x468] sm:$0xf]  ;;  %v2466_v49 = vld [vmem:[#allocation5 + $0xac] sm:$0xf]  ;;  %v2821_v56 = vor.u32 %v2518_v40, %v2157_v38 }
  0x24   :  { %1116 = vmatpush.bf16.msra.mxu2 %v2794_v10  ;;  %v2587_v48 = vld [vmem:[#allocation5 + $0x470] sm:$0xf0]  ;;  %v1955_v50 = vld [vmem:[#allocation5 + $0xb4] sm:$0xf0]  ;;  %3918 = vst [vmem:[#allocation15_spill] sm:$0xff] %v2818_v53  ;;  %v2823_v60 = vor.u32 %v2563_v42, %v2337_v41 }
  0x25   :  { %1129 = vmatpush.bf16.msra.mxu3 %v2797_v15  ;;  %v2490_v54 = vld [vmem:[#allocation5 + $0x16c] sm:$0xf]  ;;  %v2051_v55 = vld [vmem:[#allocation5 + $0x174] sm:$0xf0]  ;;  %3919 = vst [vmem:[#allocation16_spill] sm:$0xff] %v2821_v56  ;;  %v2825_v61 = vor.u32 %v2587_v48, %v2433_v43  ;;  %v2827_v62 = vor.u32 %v2466_v49, %v1955_v50  ;;  %v298_v49 = vld [vmem:[%s3817_s1] sm:$0xff] }
  0x26   :  { %1091 = vmatpush.bf16.msra.mxu0 %v2800_v24  ;;  %v2325_v0 = vld [vmem:[#allocation5 + $0x390] sm:$0xf]  ;;  %v2560_v1 = vld [vmem:[#allocation5 + $0x398] sm:$0xf0]  ;;  %v2830_v3 = vor.u32 %v2490_v54, %v2051_v55  ;;  %v2463_v11 = vld [vmem:[#allocation5 + $0x94] sm:$0xf] }
  0x27   :  { %1104 = vmatpush.bf16.msra.mxu1 %v2804_v28  ;;  %3920 = vst [vmem:[#allocation17_spill] sm:$0xff] %v2827_v62  ;;  %v2421_v2 = vld [vmem:[#allocation5 + $0x450] sm:$0xf]  ;;  %v2584_v5 = vld [vmem:[#allocation5 + $0x458] sm:$0xf0]  ;;  %v2836_v19 = vor.u32 %v2560_v1, %v2325_v0  ;;  %v2864_v1 = vpack.c.bf16 %v298_v49, %v298_v49 }
  0x28   :  { %1117 = vmatpush.bf16.msra.mxu2 %v2806_v29  ;;  %3921 = vst [vmem:[#allocation18_spill] sm:$0xff] %v2830_v3  ;;  %v1943_v12 = vld [vmem:[#allocation5 + $0x9c] sm:$0xf0]  ;;  %v2487_v14 = vld [vmem:[#allocation5 + $0x154] sm:$0xf]  ;;  %v2840_v21 = vor.u32 %v2584_v5, %v2421_v2 }
  0x29   :  { %1130 = vmatpush.bf16.msra.mxu3 %v2809_v36  ;;  %v2039_v16 = vld [vmem:[#allocation5 + $0x15c] sm:$0xf0]  ;;  %v2313_v20 = vld [vmem:[#allocation5 + $0x378] sm:$0xf]  ;;  %v2842_v23 = vor.u32 %v2463_v11, %v1943_v12  ;;  %v2557_v25 = vld [vmem:[#allocation5 + $0x380] sm:$0xf0] }
  0x2a   :  { %1092 = vmatpush.bf16.msra.mxu0 %v2812_v44  ;;  %v2409_v27 = vld [vmem:[#allocation5 + $0x438] sm:$0xf]  ;;  %v2581_v31 = vld [vmem:[#allocation5 + $0x440] sm:$0xf0]  ;;  %v2845_v32 = vor.u32 %v2487_v14, %v2039_v16  ;;  %v2460_v33 = vld [vmem:[#allocation5 + $0x7c] sm:$0xf]  ;;  %v2848_v41 = vor.u32 %v2557_v25, %v2313_v20 }
  0x2b   :  { %1105 = vmatpush.bf16.msra.mxu1 %v2816_v52  ;;  %3922 = vst [vmem:[#allocation19_spill] sm:$0xff] %v2842_v23  ;;  %v1931_v37 = vld [vmem:[#allocation5 + $0x84] sm:$0xf0]  ;;  %v2484_v38 = vld [vmem:[#allocation5 + $0x13c] sm:$0xf]  ;;  %v2850_v42 = vor.u32 %v2581_v31, %v2409_v27  ;;  %v300_v48 = vld [vmem:[%s3817_s1 + $0x10] sm:$0xff] }
  0x2c   :  { %1118 = vmatpush.bf16.msra.mxu2 %v2818_v53  ;;  %3923 = vst [vmem:[#allocation20_spill] sm:$0xff] %v2845_v32  ;;  %v2027_v40 = vld [vmem:[#allocation5 + $0x144] sm:$0xf0]  ;;  %v2301_v43 = vld [vmem:[#allocation5 + $0x360] sm:$0xf]  ;;  %v2860_v50 = vor.u32 %v2460_v33, %v1931_v37  ;;  %v2862_v0 = vpack.c.bf16 %v300_v48, %v300_v48  ;;  %v301_v2 = vld [vmem:[%s3817_s1 + $0x18] sm:$0xff] }
  0x2d   :  { %1131 = vmatpush.bf16.msra.mxu3 %v2821_v56  ;;  %v2554_v54 = vld [vmem:[#allocation5 + $0x368] sm:$0xf0]  ;;  %v2397_v55 = vld [vmem:[#allocation5 + $0x420] sm:$0xf]  ;;  %v2870_v5 = vor.u32 %v2484_v38, %v2027_v40  ;;  %v2457_v12 = vld [vmem:[#allocation5 + $0x64] sm:$0xf]  ;;  %v2872_v16 = vpack.c.bf16 %v301_v2, %v301_v2  ;;  %1093 = vmatmul.bf16.vlgmr.msra.gmra.mxu0 %v2864_v1 }
  0x2e   :  { %1137 = vmatpush.bf16.msrb.mxu0 %v2823_v60  ;;  %3924 = vst [vmem:[#allocation21_spill] sm:$0xff] %v2860_v50  ;;  %v2578_v11 = vld [vmem:[#allocation5 + $0x428] sm:$0xf0]  ;;  %v1919_v14 = vld [vmem:[#allocation5 + $0x6c] sm:$0xf0]  ;;  %v2877_v27 = vor.u32 %v2554_v54, %v2301_v43 }
  0x2f   :  { %1150 = vmatpush.bf16.msrb.mxu1 %v2825_v61  ;;  %3925 = vst [vmem:[#allocation22_spill] sm:$0xff] %v2870_v5  ;;  %v2481_v20 = vld [vmem:[#allocation5 + $0x124] sm:$0xf]  ;;  %v2015_v25 = vld [vmem:[#allocation5 + $0x12c] sm:$0xf0]  ;;  %1119 = vmatmul.bf16.vlgmr.msra.gmra.mxu2 %v2862_v0  ;;  %v2885_v33 = vor.u32 %v2578_v11, %v2397_v55  ;;  %v2887_v37 = vor.u32 %v2457_v12, %v1919_v14 }
  0x30   :  { %1163 = vmatpush.bf16.msrb.mxu2 %v2827_v62  ;;  %1132 = vmatmul.bf16.vlgmr.msra.gmra.mxu3 %v2872_v16  ;;  %v299_v31 = vld [vmem:[%s3817_s1 + $0x8] sm:$0xff]  ;;  %v2551_v40 = vld [vmem:[#allocation5 + $0x350] sm:$0xf0]  ;;  %v2892_v43 = vor.u32 %v2481_v20, %v2015_v25  ;;  %v2277_v14 = vld [vmem:[#allocation5 + $0x330] sm:$0xf] }
  0x31   :  { %1176 = vmatpush.bf16.msrb.mxu3 %v2830_v3  ;;  %3926 = vst [vmem:[#allocation23_spill] sm:$0xff] %v2887_v37  ;;  %v2289_v38 = vld [vmem:[#allocation5 + $0x348] sm:$0xf]  ;;  %v2889_v49 = vpack.c.bf16 %v299_v31, %v299_v31  ;;  %v2575_v54 = vld [vmem:[#allocation5 + $0x410] sm:$0xf0] }
  0x32   :  { %1138 = vmatpush.bf16.msrb.mxu0 %v2836_v19  ;;  %v2385_v48 = vld [vmem:[#allocation5 + $0x408] sm:$0xf]  ;;  %3927 = vst [vmem:[#allocation24_spill] sm:$0xff] %v2892_v43  ;;  %v2454_v2 = vld [vmem:[#allocation5 + $0x4c] sm:$0xf]  ;;  %v2896_v55 = vor.u32 %v2551_v40, %v2289_v38 }
  0x33   :  { %1151 = vmatpush.bf16.msrb.mxu1 %v2840_v21  ;;  %v2003_v3 = vld [vmem:[#allocation5 + $0x114] sm:$0xf0]  ;;  %v2900_v11 = vor.u32 %v2575_v54, %v2385_v48  ;;  %v2548_v20 = vld [vmem:[#allocation5 + $0x338] sm:$0xf0]  ;;  %v2373_v25 = vld [vmem:[#allocation5 + $0x3f0] sm:$0xf] }
  0x34   :  { %1164 = vmatpush.bf16.msrb.mxu2 %v2842_v23  ;;  %v2478_v23 = vld [vmem:[#allocation5 + $0x10c] sm:$0xf]  ;;  %1106 = vmatmul.bf16.vlgmr.msra.gmra.mxu1 %v2889_v49  ;;  %3928 = vst [vmem:[#allocation25_spill] sm:$0xff] %v2896_v55  ;;  %v1895_v62 = vld [vmem:[#allocation5 + $0x3c] sm:$0xf0]  ;;  %v2908_v56 = vor.u32 %v2548_v20, %v2277_v14 }
  0x35   :  { %1177 = vmatpush.bf16.msrb.mxu3 %v2845_v32  ;;  %v1907_v32 = vld [vmem:[#allocation5 + $0x54] sm:$0xf0]  ;;  %3929 = vst [vmem:[#allocation26_spill] sm:$0xff] %v2900_v11  ;;  %v2905_v31 = vor.u32 %v2478_v23, %v2003_v3  ;;  %v2475_v38 = vld [vmem:[#allocation5 + $0xf4] sm:$0xf] }
  0x36   :  { %1139 = vmatpush.bf16.msrb.mxu0 %v2848_v41  ;;  %v2902_v12 = vor.u32 %v2454_v2, %v1907_v32  ;;  %v1991_v40 = vld [vmem:[#allocation5 + $0xfc] sm:$0xf0]  ;;  %3932 = vst [vmem:[#allocation29_spill] sm:$0xff] %v2908_v56  ;;  %v2265_v54 = vld [vmem:[#allocation5 + $0x318] sm:$0xf] }
  0x37   :  { %1152 = vmatpush.bf16.msrb.mxu1 %v2850_v42  ;;  %3931 = vst [vmem:[#allocation28_spill] sm:$0xff] %v2905_v31  ;;  %v2545_v3 = vld [vmem:[#allocation5 + $0x320] sm:$0xf0]  ;;  %v2361_v23 = vld [vmem:[#allocation5 + $0x3d8] sm:$0xf]  ;;  %v2917_v2 = vor.u32 %v2475_v38, %v1991_v40 }
  0x38   :  { %1165 = vmatpush.bf16.msrb.mxu2 %v2860_v50  ;;  %3930 = vst [vmem:[#allocation27_spill] sm:$0xff] %v2902_v12  ;;  %v2451_v50 = vld [vmem:[#allocation5 + $0x34] sm:$0xf]  ;;  %v1883_v53 = vld [vmem:[#allocation5 + $0x24] sm:$0xf0]  ;;  %v2920_v36 = vor.u32 %v2545_v3, %v2265_v54 }
  0x39   :  { %1178 = vmatpush.bf16.msrb.mxu3 %v2870_v5  ;;  %v2572_v5 = vld [vmem:[#allocation5 + $0x3f8] sm:$0xf0]  ;;  %v2914_v48 = vor.u32 %v2451_v50, %v1895_v62  ;;  %3935 = vst [vmem:[#allocation32_spill] sm:$0xff] %v2917_v2  ;;  %v1979_v20 = vld [vmem:[#allocation5 + $0xe4] sm:$0xf0] }
  0x3a   :  { %1140 = vmatpush.bf16.msrb.mxu0 %v2877_v27  ;;  %v2912_v32 = vor.u32 %v2572_v5, %v2373_v25  ;;  %v2472_v14 = vld [vmem:[#allocation5 + $0xdc] sm:$0xf]  ;;  %3936 = vst [vmem:[#allocation33_spill] sm:$0xff] %v2920_v36  ;;  %v2253_v5 = vld [vmem:[#allocation5 + $0x300] sm:$0xf] }
  0x3b   :  { %1153 = vmatpush.bf16.msrb.mxu1 %v2885_v33  ;;  %3934 = vst [vmem:[#allocation31_spill] sm:$0xff] %v2914_v48  ;;  %v2542_v25 = vld [vmem:[#allocation5 + $0x308] sm:$0xf0]  ;;  %v2349_v38 = vld [vmem:[#allocation5 + $0x3c0] sm:$0xf] }
  0x3c   :  { %1166 = vmatpush.bf16.msrb.mxu2 %v2887_v37  ;;  %3933 = vst [vmem:[#allocation30_spill] sm:$0xff] %v2912_v32  ;;  %v2448_v37 = vld [vmem:[#allocation5 + $0x1c] sm:$0xf]  ;;  %v2566_v40 = vld [vmem:[#allocation5 + $0x3c8] sm:$0xf0] }
  0x3d   :  { %1179 = vmatpush.bf16.msrb.mxu3 %v2892_v43  ;;  %v2569_v43 = vld [vmem:[#allocation5 + $0x3e0] sm:$0xf0]  ;;  %v2926_v50 = vor.u32 %v2448_v37, %v1883_v53  ;;  %v1871_v29 = vld [vmem:[#allocation5 + $0xc] sm:$0xf0]  ;;  %v2147_v15 = vld [vmem:[#allocation5 + $0x234] sm:$0xf0] }
  0x3e   :  { %1141 = vmatpush.bf16.msrb.mxu0 %v2896_v55  ;;  %v2924_v62 = vor.u32 %v2569_v43, %v2361_v23  ;;  %v2469_v54 = vld [vmem:[#allocation5 + $0xc4] sm:$0xf]  ;;  %v1967_v3 = vld [vmem:[#allocation5 + $0xcc] sm:$0xf0]  ;;  %v2538_v10 = vld [vmem:[#allocation5 + $0x2ec] sm:$0xf]  ;;  %v2936_v23 = vor.u32 %v2566_v40, %v2349_v38 }
  0x3f   :  { %1154 = vmatpush.bf16.msrb.mxu1 %v2900_v11  ;;  %3938 = vst [vmem:[#allocation35_spill] sm:$0xff] %v2926_v50  ;;  %v2243_v43 = vld [vmem:[#allocation5 + $0x2f4] sm:$0xf0]  ;;  %v2562_v53 = vld [vmem:[#allocation5 + $0x3ac] sm:$0xf] }
  0x40   :  { %1167 = vmatpush.bf16.msrb.mxu2 %v2902_v12  ;;  %3937 = vst [vmem:[#allocation34_spill] sm:$0xff] %v2924_v62  ;;  %v2929_v12 = vor.u32 %v2472_v14, %v1979_v20  ;;  %v2339_v37 = vld [vmem:[#allocation5 + $0x3b4] sm:$0xf0]  ;;  %v2586_v20 = vld [vmem:[#allocation5 + $0x46c] sm:$0xf]  ;;  %v2951_v38 = vor.u32 %v2538_v10, %v2243_v43 }
  0x41   :  { %1180 = vmatpush.bf16.msrb.mxu3 %v2905_v31  ;;  %v2445_v31 = vld [vmem:[#allocation5 + $0x4] sm:$0xf]  ;;  %3941 = vst [vmem:[#allocation38_spill] sm:$0xff] %v2936_v23  ;;  %v2135_v40 = vld [vmem:[#allocation5 + $0x21c] sm:$0xf0] }
  0x42   :  { %1142 = vmatpush.bf16.msrb.mxu0 %v2908_v56  ;;  %3939 = vst [vmem:[#allocation36_spill] sm:$0xff] %v2929_v12  ;;  %v2514_v56 = vld [vmem:[#allocation5 + $0x22c] sm:$0xf]  ;;  %v2938_v14 = vor.u32 %v2445_v31, %v1871_v29  ;;  %v2953_v29 = vor.u32 %v2562_v53, %v2339_v37  ;;  %v2511_v31 = vld [vmem:[#allocation5 + $0x214] sm:$0xf] }
  0x43   :  { %1155 = vmatpush.bf16.msrb.mxu1 %v2912_v32  ;;  %v302_v32 = vld [vmem:[%s3817_s1 + $0x20] sm:$0xff]  ;;  %3945 = vst [vmem:[#allocation42_spill] sm:$0xff] %v2951_v38  ;;  %v2583_v10 = vld [vmem:[#allocation5 + $0x454] sm:$0xf]  ;;  %v2966_v53 = vor.u32 %v2511_v31, %v2135_v40  ;;  %v2411_v40 = vld [vmem:[#allocation5 + $0x444] sm:$0xf0] }
  0x44   :  { %1168 = vmatpush.bf16.msrb.mxu2 %v2914_v48  ;;  %v2932_v48 = vor.u32 %v2542_v25, %v2253_v5  ;;  %3942 = vst [vmem:[#allocation39_spill] sm:$0xff] %v2938_v14  ;;  %v2944_v5 = vor.u32 %v2469_v54, %v1967_v3  ;;  %v2946_v25 = vor.u32 %v2514_v56, %v2147_v15  ;;  %v2559_v54 = vld [vmem:[#allocation5 + $0x394] sm:$0xf]  ;;  %v2327_v3 = vld [vmem:[#allocation5 + $0x39c] sm:$0xf0] }
  0x45   :  { %1181 = vmatpush.bf16.msrb.mxu3 %v2917_v2  ;;  %v2435_v2 = vld [vmem:[#allocation5 + $0x474] sm:$0xf0]  ;;  %3946 = vst [vmem:[#allocation43_spill] sm:$0xff] %v2953_v29  ;;  %v2958_v15 = vpack.c.bf16 %v302_v32, %v302_v32  ;;  %v2423_v56 = vld [vmem:[#allocation5 + $0x45c] sm:$0xf0] }
  0x46   :  { %1143 = vmatpush.bf16.msrb.mxu0 %v2920_v36  ;;  %3940 = vst [vmem:[#allocation37_spill] sm:$0xff] %v2932_v48  ;;  %v2956_v36 = vor.u32 %v2586_v20, %v2435_v2  ;;  %v2972_v2 = vor.u32 %v2559_v54, %v2327_v3  ;;  %v2508_v37 = vld [vmem:[#allocation5 + $0x1fc] sm:$0xf]  ;;  %v2123_v20 = vld [vmem:[#allocation5 + $0x204] sm:$0xf0] }
  0x47   :  { %1156 = vmatpush.bf16.msrb.mxu1 %v2924_v62  ;;  %3943 = vst [vmem:[#allocation40_spill] sm:$0xff] %v2944_v5  ;;  %v2535_v62 = vld [vmem:[#allocation5 + $0x2d4] sm:$0xf]  ;;  %v2580_v31 = vld [vmem:[#allocation5 + $0x43c] sm:$0xf] }
  0x48   :  { %1169 = vmatpush.bf16.msrb.mxu2 %v2926_v50  ;;  %3944 = vst [vmem:[#allocation41_spill] sm:$0xff] %v2946_v25  ;;  %v303_v50 = vld [vmem:[%s3817_s1 + $0x28] sm:$0xff]  ;;  %v2468_v11 = vld [vmem:[#allocation5 + $0xb8] sm:$0xf0]  ;;  %v2057_v55 = vld [vmem:[#allocation5 + $0x170] sm:$0xf] }
  0x49   :  { %1182 = vmatpush.bf16.msrb.mxu3 %v2929_v12  ;;  %3947 = vst [vmem:[#allocation44_spill] sm:$0xff] %v2956_v36  ;;  %v2231_v12 = vld [vmem:[#allocation5 + $0x2dc] sm:$0xf0]  ;;  %v2962_v43 = vpack.c.bf16 %v303_v50, %v303_v50  ;;  %v2975_v50 = vor.u32 %v2583_v10, %v2423_v56  ;;  %v2505_v3 = vld [vmem:[#allocation5 + $0x1e4] sm:$0xf]  ;;  %s3456_s1 = sld [smem:[#allocation3 + $0x1]] }
  0x4a   :  { %1144 = vmatpush.bf16.msrb.mxu0 %v2932_v48  ;;  %3948 = vst [vmem:[#allocation45_spill] sm:$0xff] %v2966_v53  ;;  %v2970_v32 = vor.u32 %v2535_v62, %v2231_v12  ;;  %v2981_v12 = vor.u32 %v2508_v37, %v2123_v20  ;;  %v2111_v10 = vld [vmem:[#allocation5 + $0x1ec] sm:$0xf0]  ;;  %v2529_v56 = vld [vmem:[#allocation5 + $0x2a4] sm:$0xf] }
  0x4b   :  { %1157 = vmatpush.bf16.msrb.mxu1 %v2936_v23  ;;  %3950 = vst [vmem:[#allocation47_spill] sm:$0xff] %v2972_v2  ;;  %v2556_v23 = vld [vmem:[#allocation5 + $0x37c] sm:$0xf]  ;;  %v2553_v37 = vld [vmem:[#allocation5 + $0x364] sm:$0xf] }
  0x4c   :  { %1170 = vmatpush.bf16.msrb.mxu2 %v2938_v14  ;;  %3949 = vst [vmem:[#allocation46_spill] sm:$0xff] %v2970_v32  ;;  %v2532_v14 = vld [vmem:[#allocation5 + $0x2bc] sm:$0xf]  ;;  %v2303_v20 = vld [vmem:[#allocation5 + $0x36c] sm:$0xf0] }
  0x4d   :  { %1183 = vmatpush.bf16.msrb.mxu3 %v2944_v5  ;;  %3951 = vst [vmem:[#allocation48_spill] sm:$0xff] %v2975_v50  ;;  %v2219_v5 = vld [vmem:[#allocation5 + $0x2c4] sm:$0xf0]  ;;  %1145 = vmatmul.bf16.vlgmr.msrb.gmra.mxu0 %v2958_v15  ;;  %v1961_v48 = vld [vmem:[#allocation5 + $0xb0] sm:$0xf] }
  0x4e   :  { %1189 = vmatpush.bf16.msra.mxu0 %v2946_v25  ;;  %v2315_v25 = vld [vmem:[#allocation5 + $0x384] sm:$0xf0]  ;;  %1158 = vmatmul.bf16.vlgmr.msrb.gmra.mxu1 %v2962_v43  ;;  %3952 = vst [vmem:[#allocation49_spill] sm:$0xff] %v2981_v12  ;;  %v2986_v62 = vor.u32 %v2532_v14, %v2219_v5  ;;  %v3000_v14 = vor.u32 %v2553_v37, %v2303_v20  ;;  %v2502_v5 = vld [vmem:[#allocation5 + $0x1cc] sm:$0xf] }
  0x4f   :  { %1202 = vmatpush.bf16.msra.mxu1 %v2951_v38  ;;  %1171 = vmatmul.bf16.vlgmr.msrb.gmra.mxu2 %v2864_v1  ;;  %v2988_v54 = vor.u32 %v2556_v23, %v2315_v25  ;;  %v2399_v38 = vld [vmem:[#allocation5 + $0x42c] sm:$0xf0]  ;;  %v2099_v25 = vld [vmem:[#allocation5 + $0x1d4] sm:$0xf0]  ;;  %v2499_v37 = vld [vmem:[#allocation5 + $0x1b4] sm:$0xf] }
  0x50   :  { %1215 = vmatpush.bf16.msra.mxu2 %v2953_v29  ;;  %1184 = vmatmul.bf16.vlgmr.msrb.gmra.mxu3 %v2889_v49  ;;  %3953 = vst [vmem:[#allocation50_spill] sm:$0xff] %v2986_v62  ;;  %v2207_v29 = vld [vmem:[#allocation5 + $0x2ac] sm:$0xf0]  ;;  %v1949_v63 = vld [vmem:[#allocation5 + $0x98] sm:$0xf] }
  0x51   :  { %1228 = vmatpush.bf16.msra.mxu3 %v2956_v36  ;;  %3954 = vst [vmem:[#allocation51_spill] sm:$0xff] %v2988_v54  ;;  %v2991_v36 = vor.u32 %v2580_v31, %v2411_v40  ;;  %v2998_v23 = vor.u32 %v2529_v56, %v2207_v29  ;;  %v2526_v31 = vld [vmem:[#allocation5 + $0x28c] sm:$0xf]  ;;  %v2045_v59 = vld [vmem:[#allocation5 + $0x158] sm:$0xf] }
  0x52   :  { %1190 = vmatpush.bf16.msra.mxu0 %v2966_v53  ;;  %v2577_v53 = vld [vmem:[#allocation5 + $0x424] sm:$0xf]  ;;  %3958 = vst [vmem:[#allocation55_spill] sm:$0xff] %v3000_v14 }
  0x53   :  { %1203 = vmatpush.bf16.msra.mxu1 %v2970_v32  ;;  %3955 = vst [vmem:[#allocation52_spill] sm:$0xff] %v2991_v36  ;;  %v2994_v32 = vor.u32 %v2505_v3, %v2111_v10  ;;  %v3003_v40 = vor.u32 %v2577_v53, %v2399_v38  ;;  %v2574_v3 = vld [vmem:[#allocation5 + $0x40c] sm:$0xf]  ;;  %v2387_v10 = vld [vmem:[#allocation5 + $0x414] sm:$0xf0] }
  0x54   :  { %1216 = vmatpush.bf16.msra.mxu2 %v2972_v2  ;;  %3957 = vst [vmem:[#allocation54_spill] sm:$0xff] %v2998_v23  ;;  %v2550_v2 = vld [vmem:[#allocation5 + $0x34c] sm:$0xf]  ;;  %v2087_v38 = vld [vmem:[#allocation5 + $0x1bc] sm:$0xf0]  ;;  %v3015_v20 = vor.u32 %v2574_v3, %v2387_v10 }
  0x55   :  { %1229 = vmatpush.bf16.msra.mxu3 %v2975_v50  ;;  %3956 = vst [vmem:[#allocation53_spill] sm:$0xff] %v2994_v32  ;;  %v2195_v50 = vld [vmem:[#allocation5 + $0x294] sm:$0xf0]  ;;  %v2523_v53 = vld [vmem:[#allocation5 + $0x274] sm:$0xf] }
  0x56   :  { %1191 = vmatpush.bf16.msra.mxu0 %v2981_v12  ;;  %3959 = vst [vmem:[#allocation56_spill] sm:$0xff] %v3003_v40  ;;  %v2291_v12 = vld [vmem:[#allocation5 + $0x354] sm:$0xf0]  ;;  %v3010_v29 = vor.u32 %v2526_v31, %v2195_v50  ;;  %v2075_v31 = vld [vmem:[#allocation5 + $0x1a4] sm:$0xf0] }
  0x57   :  { %1204 = vmatpush.bf16.msra.mxu1 %v2986_v62  ;;  %v3006_v62 = vor.u32 %v2502_v5, %v2099_v25  ;;  %v3012_v56 = vor.u32 %v2550_v2, %v2291_v12  ;;  %3963 = vst [vmem:[#allocation60_spill] sm:$0xff] %v3015_v20  ;;  %v2571_v5 = vld [vmem:[#allocation5 + $0x3f4] sm:$0xf]  ;;  %v2375_v25 = vld [vmem:[#allocation5 + $0x3fc] sm:$0xf0] }
  0x58   :  { %1217 = vmatpush.bf16.msra.mxu2 %v2988_v54  ;;  %3961 = vst [vmem:[#allocation58_spill] sm:$0xff] %v3010_v29  ;;  %v2547_v54 = vld [vmem:[#allocation5 + $0x334] sm:$0xf]  ;;  %v2496_v12 = vld [vmem:[#allocation5 + $0x19c] sm:$0xf]  ;;  %v3027_v10 = vor.u32 %v2571_v5, %v2375_v25 }
  0x59   :  { %1230 = vmatpush.bf16.msra.mxu3 %v2991_v36  ;;  %3960 = vst [vmem:[#allocation57_spill] sm:$0xff] %v3006_v62  ;;  %v2183_v36 = vld [vmem:[#allocation5 + $0x27c] sm:$0xf0]  ;;  %v2520_v3 = vld [vmem:[#allocation5 + $0x25c] sm:$0xf] }
  0x5a   :  { %1192 = vmatpush.bf16.msra.mxu0 %v2994_v32  ;;  %3962 = vst [vmem:[#allocation59_spill] sm:$0xff] %v3012_v56  ;;  %v2279_v32 = vld [vmem:[#allocation5 + $0x33c] sm:$0xf0]  ;;  %v3022_v2 = vor.u32 %v2523_v53, %v2183_v36  ;;  %v2493_v36 = vld [vmem:[#allocation5 + $0x184] sm:$0xf] }
  0x5b   :  { %1205 = vmatpush.bf16.msra.mxu1 %v2998_v23  ;;  %v3018_v23 = vor.u32 %v2499_v37, %v2087_v38  ;;  %v3024_v50 = vor.u32 %v2547_v54, %v2279_v32  ;;  %3967 = vst [vmem:[#allocation64_spill] sm:$0xff] %v3027_v10  ;;  %v2568_v37 = vld [vmem:[#allocation5 + $0x3dc] sm:$0xf]  ;;  %v2363_v38 = vld [vmem:[#allocation5 + $0x3e4] sm:$0xf0] }
  0x5c   :  { %1218 = vmatpush.bf16.msra.mxu2 %v3000_v14  ;;  %3965 = vst [vmem:[#allocation62_spill] sm:$0xff] %v3022_v2  ;;  %v2544_v14 = vld [vmem:[#allocation5 + $0x31c] sm:$0xf]  ;;  %v2063_v53 = vld [vmem:[#allocation5 + $0x18c] sm:$0xf0] }
  0x5d   :  { %1231 = vmatpush.bf16.msra.mxu3 %v3003_v40  ;;  %3964 = vst [vmem:[#allocation61_spill] sm:$0xff] %v3018_v23  ;;  %v2171_v40 = vld [vmem:[#allocation5 + $0x264] sm:$0xf0]  ;;  %v2517_v5 = vld [vmem:[#allocation5 + $0x244] sm:$0xf] }
  0x5e   :  { %1193 = vmatpush.bf16.msra.mxu0 %v3006_v62  ;;  %3966 = vst [vmem:[#allocation63_spill] sm:$0xff] %v3024_v50  ;;  %v2267_v62 = vld [vmem:[#allocation5 + $0x324] sm:$0xf0]  ;;  %v3034_v32 = vor.u32 %v2520_v3, %v2171_v40  ;;  %v2159_v25 = vld [vmem:[#allocation5 + $0x24c] sm:$0xf0] }
  0x5f   :  { %1206 = vmatpush.bf16.msra.mxu1 %v3010_v29  ;;  %v3030_v29 = vor.u32 %v2496_v12, %v2075_v31  ;;  %v3036_v54 = vor.u32 %v2544_v14, %v2267_v62  ;;  %v2565_v12 = vld [vmem:[#allocation5 + $0x3c4] sm:$0xf]  ;;  %v2351_v31 = vld [vmem:[#allocation5 + $0x3cc] sm:$0xf0]  ;;  %v2492_v40 = vld [vmem:[#allocation5 + $0x178] sm:$0xf0]  ;;  %v3046_v3 = vor.u32 %v2517_v5, %v2159_v25 }
  0x60   :  { %1219 = vmatpush.bf16.msra.mxu2 %v3012_v56  ;;  %3969 = vst [vmem:[#allocation66_spill] sm:$0xff] %v3034_v32  ;;  %v3039_v56 = vor.u32 %v2568_v37, %v2363_v38  ;;  %v2153_v62 = vld [vmem:[#allocation5 + $0x230] sm:$0xf]  ;;  %v2516_v14 = vld [vmem:[#allocation5 + $0x238] sm:$0xf0] }
  0x61   :  { %1232 = vmatpush.bf16.msra.mxu3 %v3015_v20  ;;  %3968 = vst [vmem:[#allocation65_spill] sm:$0xff] %v3030_v29  ;;  %v2541_v20 = vld [vmem:[#allocation5 + $0x304] sm:$0xf]  ;;  %v2249_v38 = vld [vmem:[#allocation5 + $0x2f0] sm:$0xf] }
  0x62   :  { %1194 = vmatpush.bf16.msra.mxu0 %v3018_v23  ;;  %3970 = vst [vmem:[#allocation67_spill] sm:$0xff] %v3036_v54  ;;  %v2255_v23 = vld [vmem:[#allocation5 + $0x30c] sm:$0xf0]  ;;  %v2513_v25 = vld [vmem:[#allocation5 + $0x220] sm:$0xf0] }
  0x63   :  { %1207 = vmatpush.bf16.msra.mxu1 %v3022_v2  ;;  %3971 = vst [vmem:[#allocation68_spill] sm:$0xff] %v3039_v56  ;;  %v3048_v37 = vor.u32 %v2541_v20, %v2255_v23  ;;  %v3051_v2 = vor.u32 %v2565_v12, %v2351_v31  ;;  %v2489_v23 = vld [vmem:[#allocation5 + $0x160] sm:$0xf0]  ;;  %v2141_v20 = vld [vmem:[#allocation5 + $0x218] sm:$0xf] }
  0x64   :  { %1220 = vmatpush.bf16.msra.mxu2 %v3024_v50  ;;  %v3042_v50 = vor.u32 %v2493_v36, %v2063_v53  ;;  %v3055_v36 = vor.u32 %v2492_v40, %v2057_v55  ;;  %v3057_v53 = vor.u32 %v2516_v14, %v2153_v62  ;;  %v3072_v12 = vor.u32 %v2513_v25, %v2141_v20  ;;  %v1937_v31 = vld [vmem:[#allocation5 + $0x80] sm:$0xf]  ;;  %v2462_v40 = vld [vmem:[#allocation5 + $0x88] sm:$0xf0]  ;;  %v1925_v25 = vld [vmem:[#allocation5 + $0x68] sm:$0xf] }
  0x65   :  { %1233 = vmatpush.bf16.msra.mxu3 %v3027_v10  ;;  %3972 = vst [vmem:[#allocation69_spill] sm:$0xff] %v3048_v37  ;;  %v2540_v10 = vld [vmem:[#allocation5 + $0x2f8] sm:$0xf0]  ;;  %v2033_v62 = vld [vmem:[#allocation5 + $0x140] sm:$0xf] }
  0x66   :  { %1195 = vmatpush.bf16.msra.mxu0 %v3030_v29  ;;  %3973 = vst [vmem:[#allocation70_spill] sm:$0xff] %v3051_v2  ;;  %v3053_v29 = vor.u32 %v2468_v11, %v1961_v48  ;;  %v3060_v5 = vor.u32 %v2540_v10, %v2249_v38  ;;  %v2237_v11 = vld [vmem:[#allocation5 + $0x2d8] sm:$0xf]  ;;  %v2537_v48 = vld [vmem:[#allocation5 + $0x2e0] sm:$0xf0]  ;;  %v3070_v10 = vor.u32 %v2489_v23, %v2045_v59 }
  0x67   :  { %1208 = vmatpush.bf16.msra.mxu1 %v3034_v32  ;;  %3974 = vst [vmem:[#allocation71_spill] sm:$0xff] %v3055_v36  ;;  %v2465_v32 = vld [vmem:[#allocation5 + $0xa0] sm:$0xf0]  ;;  %v3075_v14 = vor.u32 %v2537_v48, %v2237_v11  ;;  %v2486_v38 = vld [vmem:[#allocation5 + $0x148] sm:$0xf0]  ;;  %v3081_v59 = vor.u32 %v2462_v40, %v1937_v31 }
  0x68   :  { %1221 = vmatpush.bf16.msra.mxu2 %v3036_v54  ;;  %3975 = vst [vmem:[#allocation72_spill] sm:$0xff] %v3057_v53  ;;  %v3066_v55 = vor.u32 %v2465_v32, %v1949_v63  ;;  %v2129_v63 = vld [vmem:[#allocation5 + $0x200] sm:$0xf]  ;;  %v2510_v32 = vld [vmem:[#allocation5 + $0x208] sm:$0xf0]  ;;  %v3086_v23 = vor.u32 %v2486_v38, %v2033_v62 }
  0x69   :  { %1234 = vmatpush.bf16.msra.mxu3 %v3039_v56  ;;  %3976 = vst [vmem:[#allocation73_spill] sm:$0xff] %v3060_v5  ;;  %v3088_v20 = vor.u32 %v2510_v32, %v2129_v63  ;;  %v2459_v11 = vld [vmem:[#allocation5 + $0x70] sm:$0xf0]  ;;  %v2021_v48 = vld [vmem:[#allocation5 + $0x128] sm:$0xf] }
  0x6a   :  { %1196 = vmatpush.bf16.msra.mxu0 %v3042_v50  ;;  %3977 = vst [vmem:[#allocation74_spill] sm:$0xff] %v3066_v55  ;;  %v2117_v31 = vld [vmem:[#allocation5 + $0x1e8] sm:$0xf]  ;;  %v2507_v40 = vld [vmem:[#allocation5 + $0x1f0] sm:$0xf0] }
  0x6b   :  { %1209 = vmatpush.bf16.msra.mxu1 %v3046_v3  ;;  %3978 = vst [vmem:[#allocation75_spill] sm:$0xff] %v3070_v10  ;;  %v2213_v56 = vld [vmem:[#allocation5 + $0x2a8] sm:$0xf]  ;;  %v2531_v54 = vld [vmem:[#allocation5 + $0x2b0] sm:$0xf0]  ;;  %v3100_v38 = vor.u32 %v2507_v40, %v2117_v31 }
  0x6c   :  { %1222 = vmatpush.bf16.msra.mxu2 %v3048_v37  ;;  %3979 = vst [vmem:[#allocation76_spill] sm:$0xff] %v3072_v12  ;;  %v2534_v37 = vld [vmem:[#allocation5 + $0x2c8] sm:$0xf0]  ;;  %v1913_v63 = vld [vmem:[#allocation5 + $0x50] sm:$0xf]  ;;  %v3103_v32 = vor.u32 %v2531_v54, %v2213_v56 }
  0x6d   :  { %1235 = vmatpush.bf16.msra.mxu3 %v3051_v2  ;;  %3980 = vst [vmem:[#allocation77_spill] sm:$0xff] %v3075_v14  ;;  %v2225_v2 = vld [vmem:[#allocation5 + $0x2c0] sm:$0xf]  ;;  %1197 = vmatmul.bf16.vlgmr.msra.gmra.mxu0 %v2862_v0  ;;  %v1901_v31 = vld [vmem:[#allocation5 + $0x38] sm:$0xf] }
  0x6e   :  { %1241 = vmatpush.bf16.msrb.mxu0 %v3053_v29  ;;  %3981 = vst [vmem:[#allocation78_spill] sm:$0xff] %v3081_v59  ;;  %1210 = vmatmul.bf16.vlgmr.msra.gmra.mxu1 %v2872_v16  ;;  %v2453_v56 = vld [vmem:[#allocation5 + $0x40] sm:$0xf0]  ;;  %v1997_v54 = vld [vmem:[#allocation5 + $0xf8] sm:$0xf] }
  0x6f   :  { %1254 = vmatpush.bf16.msrb.mxu1 %v3055_v36  ;;  %1223 = vmatmul.bf16.vlgmr.msra.gmra.mxu2 %v2958_v15  ;;  %3982 = vst [vmem:[#allocation79_spill] sm:$0xff] %v3086_v23  ;;  %v2564_v36 = vld [vmem:[#allocation5 + $0x3b8] sm:$0xf0] }
  0x70   :  { %1267 = vmatpush.bf16.msrb.mxu2 %v3057_v53  ;;  %1236 = vmatmul.bf16.vlgmr.msra.gmra.mxu3 %v2962_v43  ;;  %3983 = vst [vmem:[#allocation80_spill] sm:$0xff] %v3088_v20  ;;  %v2483_v53 = vld [vmem:[#allocation5 + $0x130] sm:$0xf0] }
  0x71   :  { %1280 = vmatpush.bf16.msrb.mxu3 %v3060_v5  ;;  %v3091_v5 = vor.u32 %v2534_v37, %v2225_v2  ;;  %v3098_v62 = vor.u32 %v2483_v53, %v2021_v48  ;;  %3987 = vst [vmem:[#allocation84_spill] sm:$0xff] %v3100_v38  ;;  %v2456_v2 = vld [vmem:[#allocation5 + $0x58] sm:$0xf0]  ;;  %v2009_v37 = vld [vmem:[#allocation5 + $0x110] sm:$0xf] }
  0x72   :  { %1242 = vmatpush.bf16.msrb.mxu0 %v3066_v55  ;;  %3988 = vst [vmem:[#allocation85_spill] sm:$0xff] %v3103_v32  ;;  %v2345_v55 = vld [vmem:[#allocation5 + $0x3b0] sm:$0xf] }
  0x73   :  { %1255 = vmatpush.bf16.msrb.mxu1 %v3070_v10  ;;  %3984 = vst [vmem:[#allocation81_spill] sm:$0xff] %v3091_v5  ;;  %v3094_v10 = vor.u32 %v2459_v11, %v1925_v25  ;;  %v2201_v25 = vld [vmem:[#allocation5 + $0x290] sm:$0xf]  ;;  %v2528_v11 = vld [vmem:[#allocation5 + $0x298] sm:$0xf0] }
  0x74   :  { %1268 = vmatpush.bf16.msrb.mxu2 %v3072_v12  ;;  %3986 = vst [vmem:[#allocation83_spill] sm:$0xff] %v3098_v62  ;;  %v2105_v12 = vld [vmem:[#allocation5 + $0x1d0] sm:$0xf]  ;;  %v3115_v40 = vor.u32 %v2528_v11, %v2201_v25  ;;  %v1985_v25 = vld [vmem:[#allocation5 + $0xe0] sm:$0xf] }
  0x75   :  { %1281 = vmatpush.bf16.msrb.mxu3 %v3075_v14  ;;  %3985 = vst [vmem:[#allocation82_spill] sm:$0xff] %v3094_v10  ;;  %v2480_v14 = vld [vmem:[#allocation5 + $0x118] sm:$0xf0] }
  0x76   :  { %1243 = vmatpush.bf16.msrb.mxu0 %v3081_v59  ;;  %v2504_v59 = vld [vmem:[#allocation5 + $0x1d8] sm:$0xf0]  ;;  %v3110_v53 = vor.u32 %v2480_v14, %v2009_v37  ;;  %3992 = vst [vmem:[#allocation89_spill] sm:$0xff] %v3115_v40  ;;  %v2450_v37 = vld [vmem:[#allocation5 + $0x28] sm:$0xf0] }
  0x77   :  { %1256 = vmatpush.bf16.msrb.mxu1 %v3086_v23  ;;  %v3106_v23 = vor.u32 %v2456_v2, %v1913_v63  ;;  %v3112_v48 = vor.u32 %v2504_v59, %v2105_v12  ;;  %v2189_v63 = vld [vmem:[#allocation5 + $0x278] sm:$0xf]  ;;  %v2525_v2 = vld [vmem:[#allocation5 + $0x280] sm:$0xf0]  ;;  %v1889_v59 = vld [vmem:[#allocation5 + $0x20] sm:$0xf] }
  0x78   :  { %1269 = vmatpush.bf16.msrb.mxu2 %v3088_v20  ;;  %3990 = vst [vmem:[#allocation87_spill] sm:$0xff] %v3110_v53  ;;  %v2093_v20 = vld [vmem:[#allocation5 + $0x1b8] sm:$0xf]  ;;  %v3127_v11 = vor.u32 %v2525_v2, %v2189_v63  ;;  %v1973_v63 = vld [vmem:[#allocation5 + $0xc8] sm:$0xf] }
  0x79   :  { %1282 = vmatpush.bf16.msrb.mxu3 %v3091_v5  ;;  %3989 = vst [vmem:[#allocation86_spill] sm:$0xff] %v3106_v23  ;;  %v2477_v5 = vld [vmem:[#allocation5 + $0x100] sm:$0xf0]  ;;  %v2471_v2 = vld [vmem:[#allocation5 + $0xd0] sm:$0xf0] }
  0x7a   :  { %1244 = vmatpush.bf16.msrb.mxu0 %v3094_v10  ;;  %3991 = vst [vmem:[#allocation88_spill] sm:$0xff] %v3112_v48  ;;  %v2501_v10 = vld [vmem:[#allocation5 + $0x1c0] sm:$0xf0]  ;;  %v3122_v12 = vor.u32 %v2477_v5, %v1997_v54  ;;  %v1877_v5 = vld [vmem:[#allocation5 + $0x8] sm:$0xf] }
  0x7b   :  { %1257 = vmatpush.bf16.msrb.mxu1 %v3098_v62  ;;  %v3118_v62 = vor.u32 %v2453_v56, %v1901_v31  ;;  %v3124_v14 = vor.u32 %v2501_v10, %v2093_v20  ;;  %3995 = vst [vmem:[#allocation92_spill] sm:$0xff] %v3127_v11  ;;  %v2177_v31 = vld [vmem:[#allocation5 + $0x260] sm:$0xf]  ;;  %v2522_v56 = vld [vmem:[#allocation5 + $0x268] sm:$0xf0] }
  0x7c   :  { %1270 = vmatpush.bf16.msrb.mxu2 %v3100_v38  ;;  %v2081_v38 = vld [vmem:[#allocation5 + $0x1a0] sm:$0xf]  ;;  %v2447_v54 = vld [vmem:[#allocation5 + $0x10] sm:$0xf0] }
  0x7d   :  { %1283 = vmatpush.bf16.msrb.mxu3 %v3103_v32  ;;  %3993 = vst [vmem:[#allocation90_spill] sm:$0xff] %v3118_v62  ;;  %v2474_v32 = vld [vmem:[#allocation5 + $0xe8] sm:$0xf0] }
  0x7e   :  { %1245 = vmatpush.bf16.msrb.mxu0 %v3106_v23  ;;  %3994 = vst [vmem:[#allocation91_spill] sm:$0xff] %v3124_v14  ;;  %v2498_v23 = vld [vmem:[#allocation5 + $0x1a8] sm:$0xf0]  ;;  %v3134_v10 = vor.u32 %v2474_v32, %v1985_v25  ;;  %v2441_v32 = vld [vmem:[#allocation5 + $0x470] sm:$0xf] }
  0x7f   :  { %1258 = vmatpush.bf16.msrb.mxu1 %v3110_v53  ;;  %v3130_v53 = vor.u32 %v2450_v37, %v1889_v59  ;;  %v3136_v20 = vor.u32 %v2498_v23, %v2081_v38  ;;  %v2165_v59 = vld [vmem:[#allocation5 + $0x248] sm:$0xf]  ;;  %v2519_v37 = vld [vmem:[#allocation5 + $0x250] sm:$0xf0]  ;;  %v2588_v23 = vld [vmem:[#allocation5 + $0x478] sm:$0xf0]  ;;  %v3146_v38 = vor.u32 %v2471_v2, %v1973_v63 }
  0x80   :  { %1271 = vmatpush.bf16.msrb.mxu2 %v3112_v48  ;;  %3997 = vst [vmem:[#allocation94_spill] sm:$0xff] %v3134_v10  ;;  %v2069_v48 = vld [vmem:[#allocation5 + $0x188] sm:$0xf]  ;;  %v2417_v63 = vld [vmem:[#allocation5 + $0x440] sm:$0xf] }
  0x81   :  { %1284 = vmatpush.bf16.msrb.mxu3 %v3115_v40  ;;  %3996 = vst [vmem:[#allocation93_spill] sm:$0xff] %v3130_v53  ;;  %v3139_v40 = vor.u32 %v2522_v56, %v2177_v31  ;;  %v3151_v31 = vor.u32 %v2519_v37, %v2165_v59  ;;  %v3153_v56 = vor.u32 %v2564_v36, %v2345_v55  ;;  %v2321_v55 = vld [vmem:[#allocation5 + $0x380] sm:$0xf]  ;;  %v2582_v2 = vld [vmem:[#allocation5 + $0x448] sm:$0xf0] }
  0x82   :  { %1246 = vmatpush.bf16.msrb.mxu0 %v3118_v62  ;;  %v2495_v62 = vld [vmem:[#allocation5 + $0x190] sm:$0xf0]  ;;  %v2393_v37 = vld [vmem:[#allocation5 + $0x410] sm:$0xf] }
  0x83   :  { %1259 = vmatpush.bf16.msrb.mxu1 %v3122_v12  ;;  %v3148_v25 = vor.u32 %v2495_v62, %v2069_v48  ;;  %v2558_v48 = vld [vmem:[#allocation5 + $0x388] sm:$0xf0] }
  0x84   :  { %1272 = vmatpush.bf16.msrb.mxu2 %v3124_v14  ;;  %v3142_v14 = vor.u32 %v2447_v54, %v1877_v5  ;;  %v2333_v5 = vld [vmem:[#allocation5 + $0x398] sm:$0xf]  ;;  %v2561_v54 = vld [vmem:[#allocation5 + $0x3a0] sm:$0xf0]  ;;  %v3173_v59 = vor.u32 %v2558_v48, %v2321_v55 }
  0x85   :  { %1285 = vmatpush.bf16.msrb.mxu3 %v3127_v11  ;;  %v3155_v11 = vor.u32 %v2588_v23, %v2441_v32  ;;  %v3162_v62 = vor.u32 %v2561_v54, %v2333_v5  ;;  %v2576_v32 = vld [vmem:[#allocation5 + $0x418] sm:$0xf0]  ;;  %v2285_v5 = vld [vmem:[#allocation5 + $0x338] sm:$0xf]  ;;  %v2573_v55 = vld [vmem:[#allocation5 + $0x400] sm:$0xf0] }
  0x86   :  { %1247 = vmatpush.bf16.msrb.mxu0 %v3130_v53  ;;  %v2429_v53 = vld [vmem:[#allocation5 + $0x458] sm:$0xf]  ;;  %v3194_v23 = vor.u32 %v2576_v32, %v2393_v37  ;;  %v4007_v32 = vld [vmem:[#allocation14_spill] sm:$0xff] }
  0x87   :  { %1260 = vmatpush.bf16.msrb.mxu1 %v3134_v10  ;;  %v2585_v10 = vld [vmem:[#allocation5 + $0x460] sm:$0xf0]  ;;  %v2381_v54 = vld [vmem:[#allocation5 + $0x3f8] sm:$0xf] }
  0x88   :  { %1273 = vmatpush.bf16.msrb.mxu2 %v3136_v20  ;;  %v3166_v36 = vor.u32 %v2585_v10, %v2429_v53  ;;  %v2555_v53 = vld [vmem:[#allocation5 + $0x370] sm:$0xf0]  ;;  %v2297_v10 = vld [vmem:[#allocation5 + $0x350] sm:$0xf]  ;;  %v3202_v48 = vor.u32 %v2573_v55, %v2381_v54  ;;  %v4009_v54 = vld [vmem:[#allocation34_spill] sm:$0xff] }
  0x89   :  { %1286 = vmatpush.bf16.msrb.mxu3 %v3139_v40  ;;  %v1324_v55 = vld [vmem:[%s3818_s2 + $0x10] sm:$0xff] }
  0x8a   :  { %1248 = vmatpush.bf16.msrb.mxu0 %v3142_v14 }
  0x8b   :  { %1261 = vmatpush.bf16.msrb.mxu1 %v3146_v38 }
  0x8c   :  { %1274 = vmatpush.bf16.msrb.mxu2 %v3148_v25 }
  0x8d   :  { %1287 = vmatpush.bf16.msrb.mxu3 %v3151_v31  ;;  %1249 = vmatmul.bf16.vlgmr.msrb.gmra.mxu0 %v2864_v1  ;;  %v2579_v1 = vld [vmem:[#allocation5 + $0x430] sm:$0xf0] }
  0x8e   :  { %1293 = vmatpush.bf16.msra.mxu0 %v3153_v56  ;;  %1262 = vmatmul.bf16.vlgmr.msrb.gmra.mxu1 %v2889_v49 }
  0x8f   :  { %1306 = vmatpush.bf16.msra.mxu1 %v3155_v11  ;;  %1275 = vmatmul.bf16.vlgmr.msrb.gmra.mxu2 %v2862_v0  ;;  %v2405_v0 = vld [vmem:[#allocation5 + $0x428] sm:$0xf] }
  0x90   :  { %1334 = vmatpush.bf16.msra.mxu2 %v2731_v4  ;;  %1288 = vmatmul.bf16.vlgmr.msrb.gmra.mxu3 %v2872_v16  ;;  %v3178_v4 = vor.u32 %v2582_v2, %v2417_v63  ;;  %v3186_v49 = vor.u32 %v2579_v1, %v2405_v0  ;;  %v2273_v63 = vld [vmem:[#allocation5 + $0x320] sm:$0xf]  ;;  %v2261_v0 = vld [vmem:[#allocation5 + $0x308] sm:$0xf] }
  0x91   :  { %1347 = vmatpush.bf16.msra.mxu3 %v2733_v8  ;;  %v2309_v8 = vld [vmem:[#allocation5 + $0x368] sm:$0xf]  ;;  %v2369_v2 = vld [vmem:[#allocation5 + $0x3e0] sm:$0xf] }
  0x92   :  { %1294 = vmatpush.bf16.msra.mxu0 %v3162_v62  ;;  %v3182_v16 = vor.u32 %v2555_v53, %v2309_v8  ;;  %v2570_v8 = vld [vmem:[#allocation5 + $0x3e8] sm:$0xf0]  ;;  %v2357_v1 = vld [vmem:[#allocation5 + $0x3c8] sm:$0xf] }
  0x93   :  { %1307 = vmatpush.bf16.msra.mxu1 %v3166_v36  ;;  %v3210_v53 = vor.u32 %v2570_v8, %v2369_v2  ;;  %v1325_v2 = vld [vmem:[%s3818_s2 + $0x18] sm:$0xff] }
  0x94   :  { %1335 = vmatpush.bf16.msra.mxu2 %v2742_v17  ;;  %v2552_v17 = vld [vmem:[#allocation5 + $0x358] sm:$0xf0] }
  0x95   :  { %1348 = vmatpush.bf16.msra.mxu3 %v2744_v18  ;;  %v3190_v18 = vor.u32 %v2552_v17, %v2297_v10  ;;  %v2567_v10 = vld [vmem:[#allocation5 + $0x3d0] sm:$0xf0] }
  0x96   :  { %1295 = vmatpush.bf16.msra.mxu0 %v3173_v59  ;;  %v3218_v17 = vor.u32 %v2567_v10, %v2357_v1  ;;  %v4011_v1 = vld [vmem:[#allocation16_spill] sm:$0xff]  ;;  %v4012_v10 = vld [vmem:[#allocation37_spill] sm:$0xff] }
  0x97   :  { %1308 = vmatpush.bf16.msra.mxu1 %v3178_v4 }
  0x98   :  { %1336 = vmatpush.bf16.msra.mxu2 %v2752_v30  ;;  %v2549_v30 = vld [vmem:[#allocation5 + $0x340] sm:$0xf0] }
  0x99   :  { %1349 = vmatpush.bf16.msra.mxu3 %v2756_v34  ;;  %v3198_v34 = vor.u32 %v2549_v30, %v2285_v5  ;;  %v4008_v5 = vld [vmem:[#allocation33_spill] sm:$0xff] }
  0x9a   :  { %1296 = vmatpush.bf16.msra.mxu0 %v3182_v16  ;;  %v1326_v30 = vld [vmem:[%s3818_s2 + $0x20] sm:$0xff] }
  0x9b   :  { %1309 = vmatpush.bf16.msra.mxu1 %v3186_v49 }
  0x9c   :  { %1337 = vmatpush.bf16.msra.mxu2 %v2764_v45  ;;  %v2546_v45 = vld [vmem:[#allocation5 + $0x328] sm:$0xf0] }
  0x9d   :  { %1350 = vmatpush.bf16.msra.mxu3 %v2768_v46  ;;  %v3206_v46 = vor.u32 %v2546_v45, %v2273_v63  ;;  %v1327_v63 = vld [vmem:[%s3818_s2 + $0x28] sm:$0xff] }
  0x9e   :  { %1297 = vmatpush.bf16.msra.mxu0 %v3190_v18 }
  0x9f   :  { %1310 = vmatpush.bf16.msra.mxu1 %v3194_v23 }
  0xa0   :  { %1338 = vmatpush.bf16.msra.mxu2 %v2776_v57  ;;  %v2543_v57 = vld [vmem:[#allocation5 + $0x310] sm:$0xf0] }
  0xa1   :  { %1351 = vmatpush.bf16.msra.mxu3 %v2780_v58  ;;  %v3214_v58 = vor.u32 %v2543_v57, %v2261_v0  ;;  %v4010_v0 = vld [vmem:[#allocation15_spill] sm:$0xff]  ;;  %v3288_v57 = vpack.c.bf16 %v1326_v30, %v1326_v30  ;;  %v4027_v30 = vld [vmem:[#allocation24_spill] sm:$0xff] }
  0xa2   :  { %1298 = vmatpush.bf16.msra.mxu0 %v3198_v34 }
  0xa3   :  { %1311 = vmatpush.bf16.msra.mxu1 %v3202_v48 }
  0xa4   :  { %1339 = vmatpush.bf16.msra.mxu2 %v2788_v6  ;;  %v1322_v6 = vld [vmem:[%s3818_s2] sm:$0xff] }
  0xa5   :  { %1352 = vmatpush.bf16.msra.mxu3 %v2792_v7  ;;  %v1323_v7 = vld [vmem:[%s3818_s2 + $0x8] sm:$0xff]  ;;  %v3230_v37 = vpack.c.bf16 %v1322_v6, %v1322_v6  ;;  %v3292_v6 = vpack.c.bf16 %v1324_v55, %v1324_v55  ;;  %s1746_s2 = sld [smem:[#allocation3]] }
  0xa6   :  { %1299 = vmatpush.bf16.msra.mxu0 %v3206_v46  ;;  %v4029_v55 = vld [vmem:[#allocation54_spill] sm:$0xff] }
  0xa7   :  { %1312 = vmatpush.bf16.msra.mxu1 %v3210_v53 }
  0xa8   :  { %1340 = vmatpush.bf16.msra.mxu2 %v2800_v24  ;;  %v3234_v24 = vpack.c.bf16 %v1323_v7, %v1323_v7  ;;  %v3294_v7 = vpack.c.bf16 %v1327_v63, %v1327_v63 }
  0xa9   :  { %1353 = vmatpush.bf16.msra.mxu3 %v2804_v28  ;;  %v3999_v28 = vld [vmem:[#allocation10_spill] sm:$0xff] }
  0xaa   :  { %1300 = vmatpush.bf16.msra.mxu0 %v3214_v58 }
  0xab   :  { %1313 = vmatpush.bf16.msra.mxu1 %v3218_v17 }
  0xac   :  { %1341 = vmatpush.bf16.msra.mxu2 %v2812_v44  ;;  %v4000_v44 = vld [vmem:[#allocation25_spill] sm:$0xff] }
  0xad   :  { %1354 = vmatpush.bf16.msra.mxu3 %v2816_v52  ;;  %1301 = vmatmul.bf16.vlgmr.msra.gmra.mxu0 %v2958_v15  ;;  %v4006_v15 = vld [vmem:[#allocation13_spill] sm:$0xff] }
  0xae   :  { %1360 = vmatpush.bf16.msrb.mxu0 %v2735_v9  ;;  %1314 = vmatmul.bf16.vlgmr.msra.gmra.mxu1 %v2962_v43  ;;  %v3250_v9 = vld [vmem:[%s3822_s6] sm:$0x7] }
  0xaf   :  { %1373 = vmatpush.bf16.msrb.mxu1 %v2738_v13  ;;  %1342 = vmatmul.bf16.vlgmr.msra.gmra.mxu2 %v3230_v37  ;;  %v311_v13 = vperm.slane %v3250_v9, 0 }
  0xb0   :  { %1386 = vmatpush.bf16.msrb.mxu2 %v2823_v60  ;;  %1355 = vmatmul.bf16.vlgmr.msra.gmra.mxu3 %v3234_v24  ;;  %v4001_v60 = vld [vmem:[#allocation26_spill] sm:$0xff] }
  0xb1   :  { %1399 = vmatpush.bf16.msrb.mxu3 %v2825_v61 }
  0xb2   :  { %1361 = vmatpush.bf16.msrb.mxu0 %v2747_v22  ;;  %v1094_v22 = vpop.f32.mrf.mxu0 }
  0xb3   :  { %1374 = vmatpush.bf16.msrb.mxu1 %v2749_v26  ;;  %v1095_v26 = vadd.f32 %v1094_v22, %v311_v13  ;;  %v4013_v22 = vld [vmem:[#allocation38_spill] sm:$0xff] }
  0xb4   :  { %1387 = vmatpush.bf16.msrb.mxu2 %v2836_v19  ;;  %v4002_v19 = vld [vmem:[#allocation11_spill] sm:$0xff] }
  0xb5   :  { %1400 = vmatpush.bf16.msrb.mxu3 %v2840_v21 }
  0xb6   :  { %1362 = vmatpush.bf16.msrb.mxu0 %v2758_v35  ;;  %v3998_v35 = vld [vmem:[#allocation9_spill] sm:$0xff] }
  0xb7   :  { %1375 = vmatpush.bf16.msrb.mxu1 %v2761_v39  ;;  %v1107_v39 = vpop.f32.mrf.mxu1 }
  0xb8   :  { %1388 = vmatpush.bf16.msrb.mxu2 %v2848_v41  ;;  %v1108_v52 = vadd.f32 %v1107_v39, %v1095_v26  ;;  %v4003_v41 = vld [vmem:[#allocation12_spill] sm:$0xff]  ;;  %v4014_v26 = vld [vmem:[#allocation17_spill] sm:$0xff]  ;;  %v4015_v39 = vld [vmem:[#allocation18_spill] sm:$0xff] }
  0xb9   :  { %1401 = vmatpush.bf16.msrb.mxu3 %v2850_v42  ;;  %v4004_v42 = vld [vmem:[#allocation29_spill] sm:$0xff] }
  0xba   :  { %1363 = vmatpush.bf16.msrb.mxu0 %v2770_v47  ;;  %v1120_v47 = vpop.f32.mrf.mxu2  ;;  %v1096_v21 = vpop.f32.mrf.mxu0 }
  0xbb   :  { %1376 = vmatpush.bf16.msrb.mxu1 %v2773_v51  ;;  %v1121_v61 = vadd.f32 %v1120_v47, %v1108_v52  ;;  %v1133_v51 = vpop.f32.mrf.mxu3  ;;  %v4018_v52 = vld [vmem:[#allocation19_spill] sm:$0xff]  ;;  %v4020_v47 = vld [vmem:[#allocation45_spill] sm:$0xff] }
  0xbc   :  { %1389 = vmatpush.bf16.msrb.mxu2 %v2877_v27 }
  0xbd   :  { %1402 = vmatpush.bf16.msrb.mxu3 %v2885_v33  ;;  %v1134_v27 = vadd.f32 %v1133_v51, %v1121_v61  ;;  %v4005_v33 = vld [vmem:[#allocation30_spill] sm:$0xff] }
  0xbe   :  { %1364 = vmatpush.bf16.msrb.mxu0 %v3998_v35  ;;  %v3298_v35 = vpack.c.bf16 %v1325_v2, %v1325_v2  ;;  %v4021_v61 = vld [vmem:[#allocation46_spill] sm:$0xff] }
  0xbf   :  { %1377 = vmatpush.bf16.msrb.mxu1 %v3999_v28  ;;  %v1109_v43 = vpop.f32.mrf.mxu1  ;;  %v4016_v28 = vld [vmem:[#allocation41_spill] sm:$0xff] }
  0xc0   :  { %1390 = vmatpush.bf16.msrb.mxu2 %v4000_v44  ;;  %v4017_v44 = vld [vmem:[#allocation42_spill] sm:$0xff] }
  0xc1   :  { %1403 = vmatpush.bf16.msrb.mxu3 %v4001_v60  ;;  %v4019_v60 = vld [vmem:[#allocation20_spill] sm:$0xff] }
  0xc2   :  { %1365 = vmatpush.bf16.msrb.mxu0 %v4002_v19  ;;  %v1122_v45 = vpop.f32.mrf.mxu2  ;;  %v4022_v19 = vld [vmem:[#allocation21_spill] sm:$0xff] }
  0xc3   :  { %1378 = vmatpush.bf16.msrb.mxu1 %v4003_v41  ;;  %v1135_v8 = vpop.f32.mrf.mxu3 }
  0xc4   :  { %1391 = vmatpush.bf16.msrb.mxu2 %v4004_v42  ;;  %v4023_v42 = vld [vmem:[#allocation22_spill] sm:$0xff]  ;;  %v4030_v8 = vld [vmem:[#allocation27_spill] sm:$0xff] }
  0xc5   :  { %1404 = vmatpush.bf16.msrb.mxu3 %v4005_v33  ;;  %v4024_v33 = vld [vmem:[#allocation49_spill] sm:$0xff] }
  0xc6   :  { %1366 = vmatpush.bf16.msrb.mxu0 %v4006_v15  ;;  %v4025_v15 = vld [vmem:[#allocation50_spill] sm:$0xff] }
  0xc7   :  { %1379 = vmatpush.bf16.msrb.mxu1 %v4007_v32  ;;  %v312_v32 = vperm.slane %v3250_v9, 1 }
  0xc8   :  { %1392 = vmatpush.bf16.msrb.mxu2 %v4008_v5  ;;  %v4026_v5 = vld [vmem:[#allocation23_spill] sm:$0xff] }
  0xc9   :  { %1405 = vmatpush.bf16.msrb.mxu3 %v4009_v54  ;;  %v4028_v54 = vld [vmem:[#allocation53_spill] sm:$0xff] }
  0xca   :  { %1367 = vmatpush.bf16.msrb.mxu0 %v4010_v0  ;;  %v1146_v51 = vpop.f32.mrf.mxu0 }
  0xcb   :  { %1380 = vmatpush.bf16.msrb.mxu1 %v4011_v1  ;;  %v1147_v21 = vadd.f32 %v1146_v51, %v1134_v27  ;;  %v1159_v41 = vpop.f32.mrf.mxu1  ;;  %v4031_v1 = vld [vmem:[#allocation28_spill] sm:$0xff] }
  0xcc   :  { %1393 = vmatpush.bf16.msrb.mxu2 %v4012_v10  ;;  %v4032_v10 = vld [vmem:[#allocation57_spill] sm:$0xff]  ;;  %v4039_v51 = vld [vmem:[#allocation36_spill] sm:$0xff] }
  0xcd   :  { %1406 = vmatpush.bf16.msrb.mxu3 %v4013_v22  ;;  %1368 = vmatmul.bf16.vlgmr.msrb.gmra.mxu0 %v3292_v6  ;;  %v3315_v43 = vadd.f32 %v1159_v41, %v1147_v21  ;;  %v4041_v21 = vld [vmem:[#allocation66_spill] sm:$0xff]  ;;  %v4042_v41 = vld [vmem:[#allocation39_spill] sm:$0xff] }
  0xce   :  { %1412 = vmatpush.bf16.msra.mxu0 %v4014_v26  ;;  %1381 = vmatmul.bf16.vlgmr.msrb.gmra.mxu1 %v3298_v35  ;;  %v4033_v26 = vld [vmem:[#allocation58_spill] sm:$0xff] }
  0xcf   :  { %1425 = vmatpush.bf16.msra.mxu1 %v4015_v39  ;;  %1394 = vmatmul.bf16.vlgmr.msrb.gmra.mxu2 %v3288_v57  ;;  %v4034_v39 = vld [vmem:[#allocation31_spill] sm:$0xff] }
  0xd0   :  { %1438 = vmatpush.bf16.msra.mxu2 %v4016_v28  ;;  %1407 = vmatmul.bf16.vlgmr.msrb.gmra.mxu3 %v3294_v7  ;;  %v4035_v28 = vld [vmem:[#allocation32_spill] sm:$0xff] }
  0xd1   :  { %1451 = vmatpush.bf16.msra.mxu3 %v4017_v44  ;;  %v4036_v44 = vld [vmem:[#allocation61_spill] sm:$0xff] }
  0xd2   :  { %1413 = vmatpush.bf16.msra.mxu0 %v4018_v52  ;;  %v1172_v27 = vpop.f32.mrf.mxu2  ;;  %v1148_v2 = vpop.f32.mrf.mxu0  ;;  %v4037_v52 = vld [vmem:[#allocation62_spill] sm:$0xff] }
  0xd3   :  { %1426 = vmatpush.bf16.msra.mxu1 %v4019_v60  ;;  %v1173_v63 = vadd.f32 %v1172_v27, %v312_v32  ;;  %v1185_v45 = vpop.f32.mrf.mxu3  ;;  %v1161_v0 = vpop.f32.mrf.mxu1  ;;  %v4052_v27 = vld [vmem:[#allocation52_spill] sm:$0xff] }
  0xd4   :  { %1439 = vmatpush.bf16.msra.mxu2 %v4020_v47 }
  0xd5   :  { %1452 = vmatpush.bf16.msra.mxu3 %v4021_v61  ;;  %v1186_v22 = vadd.f32 %v1185_v45, %v1173_v63  ;;  %v4038_v61 = vld [vmem:[#allocation35_spill] sm:$0xff]  ;;  %v4053_v63 = vld [vmem:[#allocation78_spill] sm:$0xff] }
  0xd6   :  { %1414 = vmatpush.bf16.msra.mxu0 %v4022_v19  ;;  %v4040_v19 = vld [vmem:[#allocation65_spill] sm:$0xff] }
  0xd7   :  { %1427 = vmatpush.bf16.msra.mxu1 %v4023_v42  ;;  %v4043_v42 = vld [vmem:[#allocation40_spill] sm:$0xff] }
  0xd8   :  { %1440 = vmatpush.bf16.msra.mxu2 %v4024_v33  ;;  %v4044_v33 = vld [vmem:[#allocation43_spill] sm:$0xff] }
  0xd9   :  { %1453 = vmatpush.bf16.msra.mxu3 %v4025_v15  ;;  %v4045_v15 = vld [vmem:[#allocation44_spill] sm:$0xff] }
  0xda   :  { %1415 = vmatpush.bf16.msra.mxu0 %v4026_v5  ;;  %v1174_v60 = vpop.f32.mrf.mxu2  ;;  %v4046_v5 = vld [vmem:[#allocation71_spill] sm:$0xff] }
  0xdb   :  { %1428 = vmatpush.bf16.msra.mxu1 %v4027_v30  ;;  %v1187_v47 = vpop.f32.mrf.mxu3  ;;  %v4047_v30 = vld [vmem:[#allocation47_spill] sm:$0xff] }
  0xdc   :  { %1441 = vmatpush.bf16.msra.mxu2 %v4028_v54  ;;  %v4050_v54 = vld [vmem:[#allocation75_spill] sm:$0xff] }
  0xdd   :  { %1454 = vmatpush.bf16.msra.mxu3 %v4029_v55  ;;  %v4051_v55 = vld [vmem:[#allocation51_spill] sm:$0xff] }
  0xde   :  { %1416 = vmatpush.bf16.msra.mxu0 %v4030_v8  ;;  %v4054_v8 = vld [vmem:[#allocation79_spill] sm:$0xff] }
  0xdf   :  { %1429 = vmatpush.bf16.msra.mxu1 %v4031_v1  ;;  %v4055_v1 = vld [vmem:[#allocation55_spill] sm:$0xff] }
  0xe0   :  { %1442 = vmatpush.bf16.msra.mxu2 %v4032_v10  ;;  %v4056_v10 = vld [vmem:[#allocation56_spill] sm:$0xff]  ;;  %v4059_v60 = vld [vmem:[#allocation59_spill] sm:$0xff] }
  0xe1   :  { %1455 = vmatpush.bf16.msra.mxu3 %v4033_v26  ;;  %v4057_v26 = vld [vmem:[#allocation82_spill] sm:$0xff] }
  0xe2   :  { %1417 = vmatpush.bf16.msra.mxu0 %v4034_v39 }
  0xe3   :  { %1430 = vmatpush.bf16.msra.mxu1 %v4035_v28  ;;  %v4058_v28 = vld [vmem:[#allocation83_spill] sm:$0xff] }
  0xe4   :  { %1443 = vmatpush.bf16.msra.mxu2 %v4036_v44 }
  0xe5   :  { %1456 = vmatpush.bf16.msra.mxu3 %v4037_v52 }
  0xe6   :  { %1418 = vmatpush.bf16.msra.mxu0 %v4038_v61  ;;  %v4060_v61 = vld [vmem:[#allocation60_spill] sm:$0xff] }
  0xe7   :  { %1431 = vmatpush.bf16.msra.mxu1 %v4039_v51  ;;  %v4061_v51 = vld [vmem:[#allocation86_spill] sm:$0xff] }
  0xe8   :  { %1444 = vmatpush.bf16.msra.mxu2 %v4040_v19 }
  0xe9   :  { %1457 = vmatpush.bf16.msra.mxu3 %v4041_v21  ;;  %v4062_v21 = vld [vmem:[#allocation87_spill] sm:$0xff] }
  0xea   :  { %1419 = vmatpush.bf16.msra.mxu0 %v4042_v41  ;;  %v4063_v41 = vld [vmem:[#allocation63_spill] sm:$0xff] }
  0xeb   :  { %1432 = vmatpush.bf16.msra.mxu1 %v4043_v42  ;;  %v1211_v2 = vpop.f32.mrf.mxu1  ;;  %v4064_v42 = vld [vmem:[#allocation64_spill] sm:$0xff] }
  0xec   :  { %1445 = vmatpush.bf16.msra.mxu2 %v3042_v50  ;;  %v4048_v50 = vld [vmem:[#allocation48_spill] sm:$0xff] }
  0xed   :  { %1458 = vmatpush.bf16.msra.mxu3 %v3046_v3  ;;  %1420 = vmatmul.bf16.vlgmr.msra.gmra.mxu0 %v3230_v37  ;;  %v4049_v3 = vld [vmem:[#allocation74_spill] sm:$0xff] }
  0xee   :  { %1464 = vmatpush.bf16.msrb.mxu0 %v4044_v33  ;;  %1433 = vmatmul.bf16.vlgmr.msra.gmra.mxu1 %v3234_v24  ;;  %v4065_v33 = vld [vmem:[#allocation90_spill] sm:$0xff] }
  0xef   :  { %1477 = vmatpush.bf16.msrb.mxu1 %v4045_v15  ;;  %1446 = vmatmul.bf16.vlgmr.msra.gmra.mxu2 %v3292_v6 }
  0xf0   :  { %1490 = vmatpush.bf16.msrb.mxu2 %v3053_v29  ;;  %1459 = vmatmul.bf16.vlgmr.msra.gmra.mxu3 %v3298_v35  ;;  %v1198_v29 = vpop.f32.mrf.mxu0 }
  0xf1   :  { %1503 = vmatpush.bf16.msrb.mxu3 %v4046_v5  ;;  %v1199_v45 = vadd.f32 %v1198_v29, %v1186_v22  ;;  %v4071_v29 = vld [vmem:[#allocation70_spill] sm:$0xff] }
  0xf2   :  { %1465 = vmatpush.bf16.msrb.mxu0 %v4047_v30  ;;  %v1224_v39 = vpop.f32.mrf.mxu2  ;;  %v4066_v30 = vld [vmem:[#allocation67_spill] sm:$0xff] }
  0xf3   :  { %1478 = vmatpush.bf16.msrb.mxu1 %v4048_v50  ;;  %v1212_v0 = vadd.f32 %v1211_v2, %v1199_v45  ;;  %v1237_v52 = vpop.f32.mrf.mxu3  ;;  %v1213_v19 = vpop.f32.mrf.mxu1  ;;  %v4067_v50 = vld [vmem:[#allocation68_spill] sm:$0xff] }
  0xf4   :  { %1491 = vmatpush.bf16.msrb.mxu2 %v4049_v3  ;;  %v4068_v3 = vld [vmem:[#allocation93_spill] sm:$0xff]  ;;  %v4080_v2 = vld [vmem:[#allocation88_spill] sm:$0xff] }
  0xf5   :  { %1504 = vmatpush.bf16.msrb.mxu3 %v4050_v54  ;;  %v1225_v44 = vadd.f32 %v1224_v39, %v1212_v0  ;;  %v4069_v54 = vld [vmem:[#allocation94_spill] sm:$0xff]  ;;  %v4082_v0 = vld [vmem:[#allocation91_spill] sm:$0xff]  ;;  %v3500_v39 = vld [vmem:[%s3823_s7 + $0xe0] sm:$0xff] }
  0xf6   :  { %1466 = vmatpush.bf16.msrb.mxu0 %v4051_v55  ;;  %v4070_v55 = vld [vmem:[#allocation69_spill] sm:$0xff] }
  0xf7   :  { %1479 = vmatpush.bf16.msrb.mxu1 %v4052_v27  ;;  %v3361_v47 = vadd.f32 %v1237_v52, %v1225_v44  ;;  %v4072_v27 = vld [vmem:[#allocation72_spill] sm:$0xff] }
  0xf8   :  { %1492 = vmatpush.bf16.msrb.mxu2 %v4053_v63  ;;  %v1200_v22 = vpop.f32.mrf.mxu0  ;;  %v4074_v63 = vld [vmem:[#allocation76_spill] sm:$0xff] }
  0xf9   :  { %1505 = vmatpush.bf16.msrb.mxu3 %v4054_v8  ;;  %v260_v52 = vld [vmem:[%s3823_s7 + $0x58] sm:$0xff] }
  0xfa   :  { %1467 = vmatpush.bf16.msrb.mxu0 %v4055_v1  ;;  %v1226_v15 = vpop.f32.mrf.mxu2  ;;  %v4083_v1 = vld [vmem:[#allocation92_spill] sm:$0xff] }
  0xfb   :  { %1480 = vmatpush.bf16.msrb.mxu1 %v4056_v10  ;;  %v1239_v5 = vpop.f32.mrf.mxu3  ;;  %v3551_v15 = vld [vmem:[%s3823_s7 + $0xd0] sm:$0xff] }
  0xfc   :  { %1493 = vmatpush.bf16.msrb.mxu2 %v4057_v26  ;;  %v261_v26 = vld [vmem:[%s3823_s7 + $0x60] sm:$0xff] }
  0xfd   :  { %1506 = vmatpush.bf16.msrb.mxu3 %v4058_v28  ;;  %v3506_v28 = vld [vmem:[%s3823_s7 + $0x160] sm:$0xff] }
  0xfe   :  { %1468 = vmatpush.bf16.msrb.mxu0 %v4059_v60  ;;  %v3518_v60 = vld [vmem:[%s3823_s7 + $0xd8] sm:$0xff] }
  0xff   :  { %1481 = vmatpush.bf16.msrb.mxu1 %v4060_v61  ;;  %v3525_v61 = vld [vmem:[%s3819_s3 + $0x10] sm:$0xff] }
 0x100   :  { %1494 = vmatpush.bf16.msrb.mxu2 %v4061_v51 }
 0x101   :  { %1507 = vmatpush.bf16.msrb.mxu3 %v4062_v21 }
 0x102   :  { %1469 = vmatpush.bf16.msrb.mxu0 %v4063_v41  ;;  %v3540_v41 = vld [vmem:[%s3823_s7 + $0x158] sm:$0xff] }
 0x103   :  { %1482 = vmatpush.bf16.msrb.mxu1 %v4064_v42 }
 0x104   :  { %1495 = vmatpush.bf16.msrb.mxu2 %v4065_v33  ;;  %v259_v33 = vld [vmem:[%s3823_s7 + $0x50] sm:$0xff] }
 0x105   :  { %1508 = vmatpush.bf16.msrb.mxu3 %v3122_v12  ;;  %v4073_v12 = vld [vmem:[#allocation73_spill] sm:$0xff] }
 0x106   :  { %1470 = vmatpush.bf16.msrb.mxu0 %v4066_v30  ;;  %v3557_v30 = vld [vmem:[%s3823_s7 + $0x150] sm:$0xff] }
 0x107   :  { %1483 = vmatpush.bf16.msrb.mxu1 %v4067_v50 }
 0x108   :  { %1496 = vmatpush.bf16.msrb.mxu2 %v4068_v3  ;;  %v3561_v3 = vstv %s3456_s1 }
 0x109   :  { %1509 = vmatpush.bf16.msrb.mxu3 %v4069_v54  ;;  %v258_v54 = vld [vmem:[%s3823_s7 + $0x48] sm:$0xff] }
 0x10a   :  { %1471 = vmatpush.bf16.msrb.mxu0 %v4070_v55  ;;  %v3570_v55 = vld [vmem:[%s3823_s7 + $0xc8] sm:$0xff] }
 0x10b   :  { %1484 = vmatpush.bf16.msrb.mxu1 %v4071_v29  ;;  %v3395_v45 = vpop.f32.mrf.mxu1  ;;  %v3575_v29 = vld [vmem:[%s3819_s3 + $0x18] sm:$0xff] }
 0x10c   :  { %1497 = vmatpush.bf16.msrb.mxu2 %v3142_v14  ;;  %v4075_v14 = vld [vmem:[#allocation77_spill] sm:$0xff] }
 0x10d   :  { %1510 = vmatpush.bf16.msrb.mxu3 %v3146_v38  ;;  %1472 = vmatmul.bf16.vlgmr.msrb.gmra.mxu0 %v3288_v57  ;;  %v4076_v38 = vld [vmem:[#allocation80_spill] sm:$0xff] }
 0x10e   :  { %1516 = vmatpush.bf16.msra.mxu0 %v4072_v27  ;;  %1485 = vmatmul.bf16.vlgmr.msrb.gmra.mxu1 %v3294_v7 }
 0x10f   :  { %1529 = vmatpush.bf16.msra.mxu1 %v4073_v12  ;;  %1498 = vmatmul.bf16.vlgmr.msrb.gmra.mxu2 %v3230_v37  ;;  %v4078_v37 = vld [vmem:[#allocation84_spill] sm:$0xff]  ;;  %v3584_v12 = vld [vmem:[%s3823_s7 + $0x148] sm:$0xff] }
 0x110   :  { %1542 = vmatpush.bf16.msra.mxu2 %v3153_v56  ;;  %1511 = vmatmul.bf16.vlgmr.msrb.gmra.mxu3 %v3234_v24  ;;  %v3391_v56 = vpop.f32.mrf.mxu0  ;;  %v4079_v24 = vld [vmem:[#allocation85_spill] sm:$0xff] }
 0x111   :  { %1555 = vmatpush.bf16.msra.mxu3 %v3155_v11  ;;  %v4077_v11 = vld [vmem:[#allocation81_spill] sm:$0xff] }
 0x112   :  { %1517 = vmatpush.bf16.msra.mxu0 %v4074_v63  ;;  %v257_v63 = vld [vmem:[%s3823_s7 + $0x40] sm:$0xff] }
 0x113   :  { %1530 = vmatpush.bf16.msra.mxu1 %v4075_v14  ;;  %v3593_v14 = vld [vmem:[%s3823_s7 + $0xc0] sm:$0xff] }
 0x114   :  { %1543 = vmatpush.bf16.msra.mxu2 %v3162_v62  ;;  %v3401_v62 = vpop.f32.mrf.mxu2 }
 0x115   :  { %1556 = vmatpush.bf16.msra.mxu3 %v3166_v36  ;;  %v3404_v36 = vpop.f32.mrf.mxu3 }
 0x116   :  { %1518 = vmatpush.bf16.msra.mxu0 %v4076_v38 }
 0x117   :  { %1531 = vmatpush.bf16.msra.mxu1 %v4077_v11 }
 0x118   :  { %1544 = vmatpush.bf16.msra.mxu2 %v3173_v59  ;;  %v1252_v8 = vpop.f32.mrf.mxu0  ;;  %v4081_v59 = vld [vmem:[#allocation89_spill] sm:$0xff] }
 0x119   :  { %1557 = vmatpush.bf16.msra.mxu3 %v3178_v4  ;;  %v1265_v4 = vpop.f32.mrf.mxu1 }
 0x11a   :  { %1519 = vmatpush.bf16.msra.mxu0 %v4078_v37  ;;  %v256_v37 = vld [vmem:[%s3823_s7 + $0x38] sm:$0xff] }
 0x11b   :  { %1532 = vmatpush.bf16.msra.mxu1 %v4079_v24  ;;  %v3618_v24 = vld [vmem:[%s3823_s7 + $0xb8] sm:$0xff] }
 0x11c   :  { %1545 = vmatpush.bf16.msra.mxu2 %v3182_v16  ;;  %v1278_v16 = vpop.f32.mrf.mxu2  ;;  %v3627_v4 = vld [vmem:[%s3823_s7 + $0x138] sm:$0xff] }
 0x11d   :  { %1558 = vmatpush.bf16.msra.mxu3 %v3186_v49  ;;  %v1291_v49 = vpop.f32.mrf.mxu3 }
 0x11e   :  { %1520 = vmatpush.bf16.msra.mxu0 %v4080_v2  ;;  %v3644_v49 = vld [vmem:[%s3823_s7 + $0xb0] sm:$0xff] }
 0x11f   :  { %1533 = vmatpush.bf16.msra.mxu1 %v4081_v59 }
 0x120   :  { %1546 = vmatpush.bf16.msra.mxu2 %v3190_v18  ;;  %v264_v18 = vld [vmem:[%s3823_s7 + $0x78] sm:$0xff] }
 0x121   :  { %1559 = vmatpush.bf16.msra.mxu3 %v3194_v23  ;;  %v3425_v23 = vld [vmem:[%s3823_s7 + $0xf8] sm:$0xff] }
 0x122   :  { %1521 = vmatpush.bf16.msra.mxu0 %v4082_v0 }
 0x123   :  { %1534 = vmatpush.bf16.msra.mxu1 %v4083_v1 }
 0x124   :  { %1547 = vmatpush.bf16.msra.mxu2 %v3198_v34  ;;  %v3443_v34 = vld [vmem:[%s3823_s7 + $0xf0] sm:$0xff] }
 0x125   :  { %1560 = vmatpush.bf16.msra.mxu3 %v3202_v48 }
 0x126   :  { %1522 = vmatpush.bf16.msra.mxu0 %v3136_v20  ;;  %v3430_v20 = vld [vmem:[%s3823_s7 + $0x178] sm:$0xff] }
 0x127   :  { %1535 = vmatpush.bf16.msra.mxu1 %v3139_v40  ;;  %v1741_v40 = vlaneseq }
 0x128   :  { %1548 = vmatpush.bf16.msra.mxu2 %v3206_v46  ;;  %v3454_v46 = vstv %s1746_s2 }
 0x129   :  { %1561 = vmatpush.bf16.msra.mxu3 %v3210_v53  ;;  %v3452_v48 = vand.u32 127, %v1741_v40  ;;  %v262_v53 = vld [vmem:[%s3823_s7 + $0x68] sm:$0xff]  ;;  %v3652_v40 = vld [vmem:[%s3823_s7 + $0x130] sm:$0xff] }
 0x12a   :  { %1523 = vmatpush.bf16.msra.mxu0 %v3148_v25  ;;  %v263_v25 = vld [vmem:[%s3823_s7 + $0x70] sm:$0xff]  ;;  %v3520_v22 = vpop.f32.mrf.mxu0 }
 0x12b   :  { %1536 = vmatpush.bf16.msra.mxu1 %v3151_v31  ;;  %v3450_v31 = vld [vmem:[%s3823_s7 + $0x170] sm:$0xff]  ;;  %v3489_v10 = vadd.s32 256, %v3452_v48  ;;  %vm1748_vm0 = vcmp.eq.s32.totalorder %v3452_v48, %v3454_v46  ;;  %v3528_v51 = vadd.s32 384, %v3452_v48  ;;  %v3542_v42 = vpop.f32.mrf.mxu1  ;;  %vm1763_vm4 = vcmp.eq.s32.totalorder %v3452_v48, %v3561_v3 }
 0x12c   :  { %1549 = vmatpush.bf16.msra.mxu2 %v3214_v58  ;;  %v3466_v58 = vld [vmem:[%s3823_s7 + $0xe8] sm:$0xff] }
 0x12d   :  { %1562 = vmatpush.bf16.msra.mxu3 %v3218_v17  ;;  %1524 = vmatmul.bf16.vlgmr.msra.gmra.mxu0 %v3292_v6  ;;  %v3471_v17 = vld [vmem:[%s3819_s3] sm:$0xff]  ;;  %v3478_v6 = vld [vmem:[%s3823_s7 + $0x168] sm:$0xff]  ;;  %vm1750_vm2 = vcmp.eq.s32.totalorder %v3489_v10, %v3454_v46  ;;  %vm1751_vm3 = vcmp.eq.s32.totalorder %v3528_v51, %v3454_v46  ;;  %vm1765_vm6 = vcmp.eq.s32.totalorder %v3489_v10, %v3561_v3 }
 0x12e   :  { %1574 = vmatpush.msrb.mxu0 %v264_v18  ;;  %1537 = vmatmul.bf16.vlgmr.msra.gmra.mxu1 %v3298_v35  ;;  %v3486_v35 = vadd.s32 128, %v3452_v48  ;;  %v1752_v44 = vsel %vm1748_vm0, %v3471_v17, 0.0  ;;  %v1754_v50 = vsel %vm1750_vm2, %v3525_v61, 0.0  ;;  %v1767_v1 = vsel %vm1763_vm4, %v3471_v17, 0.0  ;;  %v253_v10 = vld [vmem:[%s3823_s7 + $0x20] sm:$0xff] }
 0x12f   :  { %1594 = vmatpush.msrb.mxu1 %v3425_v23  ;;  %1550 = vmatmul.bf16.vlgmr.msra.gmra.mxu2 %v3288_v57  ;;  %v313_v57 = vperm.slane %v3250_v9, 2  ;;  %vm1766_vm7 = vcmp.eq.s32.totalorder %v3528_v51, %v3561_v3  ;;  %vm1846_vm0 = vcmp.eq.s32.totalorder %v3452_v48, 0 }
 0x130   :  { %1614 = vmatpush.msrb.mxu2 %v3430_v20  ;;  %1563 = vmatmul.bf16.vlgmr.msra.gmra.mxu3 %v3294_v7  ;;  %v3483_v7 = vld [vmem:[%s3819_s3 + $0x8] sm:$0xff]  ;;  %vm1749_vm1 = vcmp.eq.s32.totalorder %v3486_v35, %v3454_v46  ;;  %vm1764_vm5 = vcmp.eq.s32.totalorder %v3486_v35, %v3561_v3  ;;  %v1769_v35 = vsel %vm1765_vm6, %v3525_v61, 0.0  ;;  %v3695_v61 = vld [vmem:[%s3823_s7 + $0x98] sm:$0xff]  ;;  %v3718_v3 = vld [vmem:[%s3823_s7 + $0x110] sm:$0xff] }
 0x131   :  { %1575 = vmatpush.msrb.mxu0 %v263_v25  ;;  %1595 = vmatpush.msrb.mxu1 %v3443_v34  ;;  %v1753_v19 = vsel %vm1749_vm1, %v3483_v7, 0.0  ;;  %v1251_v21 = vadd.f32 %v3391_v56, %v313_v57  ;;  %v3603_v56 = vld [vmem:[%s3823_s7 + $0x140] sm:$0xff]  ;;  %v1768_v16 = vsel %vm1764_vm5, %v3483_v7, 0.0  ;;  %v3661_v46 = vld [vmem:[%s3823_s7 + $0xa8] sm:$0xff]  ;;  %vm1853_vm1 = vcmp.eq.s32.totalorder %v3452_v48, 1 }
 0x132   :  { %1615 = vmatpush.msrb.mxu2 %v3450_v31  ;;  %1634 = vmatpush.msrb.mxu3 %v264_v18  ;;  %v1756_v5 = vadd.f32 %v1753_v19, %v1752_v44  ;;  %v3605_v11 = vpop.f32.mrf.mxu2  ;;  %v1304_v8 = vpop.f32.mrf.mxu0  ;;  %v3668_v7 = vld [vmem:[%s3823_s7 + $0x128] sm:$0xff] }
 0x133   :  { %1576 = vmatpush.msrb.mxu0 %v262_v53  ;;  %1596 = vmatpush.msrb.mxu1 %v3466_v58  ;;  %v1264_v27 = vadd.f32 %v3395_v45, %v1251_v21  ;;  %v1755_v45 = vsel %vm1751_vm3, %v3575_v29, 0.0  ;;  %v3620_v2 = vpop.f32.mrf.mxu3  ;;  %v1317_v0 = vpop.f32.mrf.mxu1  ;;  %v1319_v8 = vmax.f32 %v3315_v43, 0.0 }
 0x134   :  { %1616 = vmatpush.msrb.mxu2 %v3478_v6  ;;  %1635 = vmatpush.msrb.mxu3 %v263_v25  ;;  %v1757_v38 = vadd.f32 %v1756_v5, %v1754_v50  ;;  %v254_v25 = vld [vmem:[%s3823_s7 + $0x28] sm:$0xff]  ;;  %v1770_v5 = vsel %vm1766_vm7, %v3575_v29, 0.0  ;;  %v251_v50 = vld [vmem:[%s3823_s7 + $0x10] sm:$0xff]  ;;  %v1320_v0 = vmax.f32 %v3361_v47, 0.0 }
 0x135   :  { %1577 = vmatpush.msrb.mxu0 %v261_v26  ;;  %1597 = vmatpush.msrb.mxu1 %v3500_v39  ;;  %v1277_v59 = vadd.f32 %v3401_v62, %v1264_v27  ;;  %v255_v62 = vld [vmem:[%s3823_s7 + $0x30] sm:$0xff]  ;;  %v3727_v29 = vld [vmem:[%s3823_s7 + $0x88] sm:$0xff] }
 0x136   :  { %1617 = vmatpush.msrb.mxu2 %v3506_v28  ;;  %1636 = vmatpush.msrb.mxu3 %v262_v53  ;;  %v1758_v18 = vadd.f32 %v1757_v38, %v1755_v45  ;;  %v1771_v53 = vadd.f32 %v1768_v16, %v1767_v1  ;;  %v3734_v38 = vld [vmem:[%s3823_s7 + $0x108] sm:$0xff]  ;;  %v249_v45 = vld [vmem:[%s3823_s7] sm:$0xff] }
 0x137   :  { %1578 = vmatpush.msrb.mxu0 %v260_v52  ;;  %1598 = vmatpush.msrb.mxu1 %v3518_v60  ;;  %v1290_v17 = vadd.f32 %v3404_v36, %v1277_v59  ;;  %v3678_v36 = vld [vmem:[%s3823_s7 + $0xa0] sm:$0xff]  ;;  %v1344_v59 = vadd.f32 %v3605_v11, %v311_v13 }
 0x138   :  { %1618 = vmatpush.msrb.mxu2 %v3540_v41  ;;  %1637 = vmatpush.msrb.mxu3 %v261_v26  ;;  %v3686_v26 = vld [vmem:[%s3823_s7 + $0x120] sm:$0xff]  ;;  %v1772_v19 = vadd.f32 %v1771_v53, %v1769_v35 }
 0x139   :  { %1579 = vmatpush.msrb.mxu0 %v259_v33  ;;  %1599 = vmatpush.msrb.mxu1 %v3551_v15  ;;  %v1303_v21 = vadd.f32 %v3520_v22, %v1290_v17  ;;  %v3712_v22 = vld [vmem:[%s3823_s7 + $0x90] sm:$0xff]  ;;  %v1357_v16 = vadd.f32 %v3620_v2, %v1344_v59 }
 0x13a   :  { %1619 = vmatpush.msrb.mxu2 %v3557_v30  ;;  %1638 = vmatpush.msrb.mxu3 %v260_v52  ;;  %v1345_v44 = vpop.f32.mrf.mxu2  ;;  %v252_v52 = vld [vmem:[%s3823_s7 + $0x18] sm:$0xff]  ;;  %v1773_v27 = vadd.f32 %v1772_v19, %v1770_v5 }
 0x13b   :  { %1580 = vmatpush.msrb.mxu0 %v258_v54  ;;  %1600 = vmatpush.msrb.mxu1 %v3570_v55  ;;  %v1358_v51 = vpop.f32.mrf.mxu3 }
 0x13c   :  { %1620 = vmatpush.msrb.mxu2 %v3584_v12  ;;  %1639 = vmatpush.msrb.mxu3 %v259_v33  ;;  %v3702_v33 = vld [vmem:[%s3823_s7 + $0x118] sm:$0xff] }
 0x13d   :  { %1581 = vmatpush.msrb.mxu0 %v257_v63  ;;  %1601 = vmatpush.msrb.mxu1 %v3593_v14 }
 0x13e   :  { %1621 = vmatpush.msrb.mxu2 %v3603_v56  ;;  %1640 = vmatpush.msrb.mxu3 %v258_v54  ;;  %v250_v54 = vld [vmem:[%s3823_s7 + $0x8] sm:$0xff] }
 0x13f   :  { %1582 = vmatpush.msrb.mxu0 %v256_v37  ;;  %1602 = vmatpush.msrb.mxu1 %v3618_v24 }
 0x140   :  { %1622 = vmatpush.msrb.mxu2 %v3627_v4  ;;  %1641 = vmatpush.msrb.mxu3 %v257_v63  ;;  %v1316_v63 = vadd.f32 %v3542_v42, %v1303_v21  ;;  %v281_v42 = vld [vmem:[%s3823_s7 + $0x100] sm:$0xff] }
 0x141   :  { %1583 = vmatpush.msrb.mxu0 %v255_v62  ;;  %1603 = vmatpush.msrb.mxu1 %v3644_v49 }
 0x142   :  { %1623 = vmatpush.msrb.mxu2 %v3652_v40  ;;  %1759 = vadd.xlane.f32.xlu0 %v1758_v18  ;;  %v1321_v1 = vmax.f32 %v1316_v63, 0.0 }
 0x143   :  { %1584 = vmatpush.msrb.mxu0 %v254_v25  ;;  %1604 = vmatpush.msrb.mxu1 %v3661_v46 }
 0x144   :  { %1624 = vmatpush.msrb.mxu2 %v3668_v7  ;;  %1642 = vmatpush.msrb.mxu3 %v256_v37  ;;  %v3743_v37 = vld [vmem:[%s3823_s7 + $0x80] sm:$0xff] }
 0x145   :  { %1585 = vmatpush.msrb.mxu0 %v253_v10  ;;  %1605 = vmatpush.msrb.mxu1 %v3678_v36 }
 0x146   :  { %1625 = vmatpush.msrb.mxu2 %v3686_v26  ;;  %1643 = vmatpush.msrb.mxu3 %v255_v62 }
 0x147   :  { %1586 = vmatpush.msrb.mxu0 %v252_v52  ;;  %1606 = vmatpush.msrb.mxu1 %v3695_v61 }
 0x148   :  { %1626 = vmatpush.msrb.mxu2 %v3702_v33  ;;  %1644 = vmatpush.msrb.mxu3 %v254_v25 }
 0x149   :  { %1587 = vmatpush.msrb.mxu0 %v251_v50  ;;  %1607 = vmatpush.msrb.mxu1 %v3712_v22 }
 0x14a   :  { %1627 = vmatpush.msrb.mxu2 %v3718_v3  ;;  %1645 = vmatpush.msrb.mxu3 %v253_v10  ;;  %v1369_v13 = vpop.f32.mrf.mxu0 }
 0x14b   :  { %1588 = vmatpush.msrb.mxu0 %v250_v54  ;;  %1608 = vmatpush.msrb.mxu1 %v3727_v29  ;;  %v1370_v43 = vadd.f32 %v1369_v13, %v1357_v16  ;;  %v1382_v47 = vpop.f32.mrf.mxu1 }
 0x14c   :  { %1628 = vmatpush.msrb.mxu2 %v3734_v38  ;;  %1774 = vadd.xlane.f32.xlu0 %v1773_v27 }
 0x14d   :  { %1589 = vmatpush.msrb.mxu0 %v249_v45  ;;  %1609 = vmatpush.msrb.mxu1 %v3743_v37  ;;  %v1383_v11 = vadd.f32 %v1382_v47, %v1370_v43 }
 0x14e   :  { %1629 = vmatpush.msrb.mxu2 %v281_v42  ;;  %1590 = vmatmul.f32.vlgmr.msrb.gmra.mxu0 %v1319_v8 }
 0x14f   :  { %1610 = vmatmul.f32.vlgmr.msrb.gmra.mxu1 %v1320_v0  ;;  %1630 = vmatmul.f32.vlgmr.msrb.gmra.mxu2 %v1321_v1 }
 0x150   :  { %1646 = vmatpush.msrb.mxu3 %v252_v52  ;;  %1654 = vmatpush.msra.mxu0 %v3425_v23 }
 0x151   :  { %1674 = vmatpush.msra.mxu1 %v3430_v20 }
 0x152   :  { %1647 = vmatpush.msrb.mxu3 %v251_v50  ;;  %1655 = vmatpush.msra.mxu0 %v3443_v34  ;;  %v1395_v23 = vpop.f32.mrf.mxu2  ;;  %v1371_v2 = vpop.f32.mrf.mxu0 }
 0x153   :  { %1675 = vmatpush.msra.mxu1 %v3450_v31  ;;  %v1396_v20 = vadd.f32 %v1395_v23, %v1383_v11  ;;  %v1408_v34 = vpop.f32.mrf.mxu3 }
 0x154   :  { %1648 = vmatpush.msrb.mxu3 %v250_v54  ;;  %1656 = vmatpush.msra.mxu0 %v3466_v58  ;;  %v1384_v58 = vpop.f32.mrf.mxu1 }
 0x155   :  { %1676 = vmatpush.msra.mxu1 %v3478_v6  ;;  %v1409_v31 = vadd.f32 %v1408_v34, %v1396_v20 }
 0x156   :  { %1649 = vmatpush.msrb.mxu3 %v249_v45  ;;  %1657 = vmatpush.msra.mxu0 %v3500_v39 }
 0x157   :  { %1677 = vmatpush.msra.mxu1 %v3506_v28  ;;  %v1568_v6 = vmax.f32 %v1409_v31, 0.0 }
 0x158   :  { %1658 = vmatpush.msra.mxu0 %v3518_v60 }
 0x159   :  { %1678 = vmatpush.msra.mxu1 %v3540_v41  ;;  %1650 = vmatmul.f32.vlgmr.msrb.gmra.mxu3 %v1568_v6 }
 0x15a   :  { %1659 = vmatpush.msra.mxu0 %v3551_v15  ;;  %v1397_v39 = vpop.f32.mrf.mxu2 }
 0x15b   :  { %1679 = vmatpush.msra.mxu1 %v3557_v30  ;;  %v1410_v28 = vpop.f32.mrf.mxu3 }
 0x15c   :  { %1660 = vmatpush.msra.mxu0 %v3570_v55  ;;  %v2598_v28 = vld [vmem:[#allocation4] ss:$0 sm:$0xff] }
 0x15d   :  { %1680 = vmatpush.msra.mxu1 %v3584_v12 }
 0x15e   :  { %1661 = vmatpush.msra.mxu0 %v3593_v14 }
 0x15f   :  { %1681 = vmatpush.msra.mxu1 %v3603_v56 }
 0x160   :  { %1662 = vmatpush.msra.mxu0 %v3618_v24 }
 0x161   :  { %1682 = vmatpush.msra.mxu1 %v3627_v4 }
 0x162   :  { %1663 = vmatpush.msra.mxu0 %v3644_v49 }
 0x163   :  { %1683 = vmatpush.msra.mxu1 %v3652_v40 }
 0x164   :  { %1664 = vmatpush.msra.mxu0 %v3661_v46 }
 0x165   :  { %1684 = vmatpush.msra.mxu1 %v3668_v7 }
 0x166   :  { %1665 = vmatpush.msra.mxu0 %v3678_v36 }
 0x167   :  { %1685 = vmatpush.msra.mxu1 %v3686_v26 }
 0x168   :  { %1666 = vmatpush.msra.mxu0 %v3695_v61 }
 0x169   :  { %1686 = vmatpush.msra.mxu1 %v3702_v33 }
 0x16a   :  { %1667 = vmatpush.msra.mxu0 %v3712_v22  ;;  %v1421_v60 = vpop.f32.mrf.mxu0 }
 0x16b   :  { %1687 = vmatpush.msra.mxu1 %v3718_v3  ;;  %v1434_v41 = vpop.f32.mrf.mxu1  ;;  %v1422_v14 = vadd.f32 %v1421_v60, %v312_v32 }
 0x16c   :  { %1668 = vmatpush.msra.mxu0 %v3727_v29 }
 0x16d   :  { %1688 = vmatpush.msra.mxu1 %v3734_v38  ;;  %v1435_v4 = vadd.f32 %v1434_v41, %v1422_v14 }
 0x16e   :  { %1669 = vmatpush.msra.mxu0 %v3743_v37 }
 0x16f   :  { %1689 = vmatpush.msra.mxu1 %v281_v42 }
 0x172   :  { %v1447_v15 = vpop.f32.mrf.mxu2  ;;  %v1423_v30 = vpop.f32.mrf.mxu0 }
 0x173   :  { %v1460_v55 = vpop.f32.mrf.mxu3  ;;  %v1436_v12 = vpop.f32.mrf.mxu1  ;;  %v1448_v62 = vadd.f32 %v1447_v15, %v1435_v4 }
 0x175   :  { %v1461_v49 = vadd.f32 %v1460_v55, %v1448_v62 }
 0x17a   :  { %v1449_v56 = vpop.f32.mrf.mxu2 }
 0x17b   :  { %v1462_v24 = vpop.f32.mrf.mxu3 }
 0x18a   :  { %v1473_v18 = vpop.f32.mrf.mxu0 }
 0x18b   :  { %v1474_v40 = vadd.f32 %v1473_v18, %v1461_v49  ;;  %v1486_v25 = vpop.f32.mrf.mxu1 }
 0x18d   :  { %v1487_v46 = vadd.f32 %v1486_v25, %v1474_v40 }
 0x18f   :  { %v1569_v53 = vmax.f32 %v1487_v46, 0.0 }
 0x191   :  { %1670 = vmatmul.f32.vlgmr.msra.gmra.mxu0 %v1569_v53 }
 0x192   :  { %v1499_v17 = vpop.f32.mrf.mxu2  ;;  %v1475_v35 = vpop.f32.mrf.mxu0 }
 0x193   :  { %v1512_v7 = vpop.f32.mrf.mxu3  ;;  %v1488_v10 = vpop.f32.mrf.mxu1  ;;  %v1500_v32 = vadd.f32 %v1499_v17, %v313_v57 }
 0x195   :  { %v1513_v44 = vadd.f32 %v1512_v7, %v1500_v32 }
 0x19a   :  { %v1501_v36 = vpop.f32.mrf.mxu2 }
 0x19b   :  { %v1514_v26 = vpop.f32.mrf.mxu3 }
 0x1aa   :  { %v1525_v52 = vpop.f32.mrf.mxu0 }
 0x1ab   :  { %v1538_v61 = vpop.f32.mrf.mxu1  ;;  %v1526_v51 = vadd.f32 %v1525_v52, %v1513_v44 }
 0x1ad   :  { %v1539_v19 = vadd.f32 %v1538_v61, %v1526_v51 }
 0x1b2   :  { %v1551_v21 = vpop.f32.mrf.mxu2  ;;  %v1527_v50 = vpop.f32.mrf.mxu0 }
 0x1b3   :  { %v1564_v33 = vpop.f32.mrf.mxu3  ;;  %v1552_v5 = vadd.f32 %v1551_v21, %v1539_v19  ;;  %v1540_v22 = vpop.f32.mrf.mxu1 }
 0x1b4   :  { %v2669_v22 = vmov 0  }
 0x1b5   :  { %v1565_v3 = vadd.f32 %v1564_v33, %v1552_v5  ;;  %v1760_v63 = vpop.xlane.xlu0 %1759  ;;  %v1807_v5 = vld [vmem:[%s3820_s4] sm:$0xff]  ;;  %2596 = vset.pattern.permute.xlu1 %v2669_v22  ;;  %2597 = vset.pattern.permute.xlu0 %v2669_v22 }
 0x1b6   :  { %vm1808_vm12 = vcmp.eq.s32.totalorder %v1807_v5, 1 }
 0x1b7   :  { %v1570_v54 = vmax.f32 %v1565_v3, 0.0 }
 0x1b9   :  { %1690 = vmatmul.f32.vlgmr.msra.gmra.mxu1 %v1570_v54 }
 0x1ba   :  { %v1553_v29 = vpop.f32.mrf.mxu2 }
 0x1bb   :  { %v1566_v27 = vpop.f32.mrf.mxu3 }
 0x1bf   :  { %v1775_v38 = vpop.xlane.xlu0 %1774 }
 0x1c0   :  { %v1776_v45 = vmax.f32 %v1760_v63, %v1775_v38 }
 0x1c2   :  { %v1777_v9 = vsub.f32 %v1760_v63, %v1776_v45  ;;  %v1780_v57 = vsub.f32 %v1775_v38, %v1776_v45 }
 0x1c4   :  { %v1778_v37 = vmul.f32 1.442695, %v1777_v9  ;;  %v1781_v42 = vmul.f32 1.442695, %v1780_v57 }
 0x1c6   :  { %2599 = vpow2.f32 %v1778_v37 }
 0x1c7   :  { %2601 = vpow2.f32 %v1781_v42 }
 0x1cb   :  { %v1591_v41 = vpop.f32.mrf.mxu0 }
 0x1cc   :  { %v2600_v8 = vpop.eup %2599  ;;  %v1592_v30 = vadd.f32 %v2598_v28, %v1591_v41  ;;  %v1611_v14 = vpop.f32.mrf.mxu1 }
 0x1cd   :  { %v2602_v59 = vpop.eup %2601 }
 0x1ce   :  { %v1783_v0 = vadd.f32 %v2602_v59, %v2600_v8  ;;  %v1612_v24 = vadd.f32 %v1611_v14, %v1592_v30 }
 0x1d0   :  { %2603 = vrcp.f32 %v1783_v0  ;;  %vm1789_vm8 = vweird.f32 %v1783_v0  ;;  %v1795_v47 = vand.u32 2147483648, %v1783_v0  ;;  %v1793_v23 = vand.u32 2147483647, %v1783_v0 }
 0x1d2   :  { %v1796_v20 = vor.u32 1.1754944e-38, %v1795_v47  ;;  %vm1794_vm11 = vcmp.eq.f32.partialorder %v1793_v23, 8.507059e+37  ;;  %v1631_v56 = vpop.f32.mrf.mxu2 }
 0x1d3   :  { %v1632_v62 = vadd.f32 %v1631_v56, %v1612_v24 }
 0x1d5   :  { %v1695_v18 = vand.u32 2147483647, %v1632_v62  ;;  %v1694_v57 = vmax.f32 %v1632_v62, 0.0 }
 0x1d6   :  { %v2604_v1 = vpop.eup %2603 }
 0x1d7   :  { %v1785_v16 = vmul.f32 %v2604_v1, %v1783_v0  ;;  %vm1790_vm9 = vweird.f32 %v2604_v1  ;;  %v1696_v46 = vsub.f32 0.0, %v1695_v18 }
 0x1d8   :  { %vm1791_vm10 = vmor %vm1789_vm8, %vm1790_vm9 }
 0x1d9   :  { %v1786_v13 = vsub.f32 1.0, %v1785_v16  ;;  %v1697_v17 = vmul.f32 1.442695, %v1696_v46 }
 0x1db   :  { %v1787_v43 = vmul.f32 %v2604_v1, %v1786_v13 }
 0x1dc   :  { %v1651_v10 = vpop.f32.mrf.mxu3 }
 0x1dd   :  { %v1788_v11 = vadd.f32 %v2604_v1, %v1787_v43  ;;  %v1652_v44 = vadd.f32 %v2598_v28, %v1651_v10  ;;  %v2671_v43 = vmov 8.0  }
 0x1df   :  { %v1792_v34 = vsel %vm1791_vm10, %v2604_v1, %v1788_v11 }
 0x1e0   :  { %v1797_v31 = vsel %vm1794_vm11, %v1796_v20, %v1792_v34 }
 0x1e1   :  { %v1799_v2 = vmul.f32 %v2600_v8, %v1797_v31  ;;  %v1803_v58 = vmul.f32 %v2602_v59, %v1797_v31  ;;  %v2670_v8 = vmov 0.0  }
 0x1e2   :  { %v2444_v59 = vsel %vm1808_vm12, 1.0, %v2670_v8 }
 0x1e3   :  { %v1800_v6 = vadd.f32 1e-15, %v1799_v2  ;;  %v1804_v39 = vadd.f32 1e-15, %v1803_v58  ;;  %v1834_v16 = vsub.f32 1.0, %v2444_v59 }
 0x1e5   :  { %2605 = vlog2.f32 %v1800_v6 }
 0x1e6   :  { %2607 = vlog2.f32 %v1804_v39 }
 0x1eb   :  { %v2606_v60 = vpop.eup %2605 }
 0x1ec   :  { %v2608_v15 = vpop.eup %2607  ;;  %v3792_v55 = vmul.f32 0.6931472, %v2606_v60 }
 0x1ed   :  { %v3794_v12 = vmul.f32 0.6931472, %v2608_v15 }
 0x1ef   :  { %v1811_v4 = vmax.f32 %v3792_v55, %v3794_v12  ;;  %v1822_v27 = vsel %vm1808_vm12, %v3794_v12, %v3792_v55  ;;  %vm1833_vm14 = vcmp.gt.f32.partialorder %v3794_v12, %v3792_v55 }
 0x1f0   :  { %v1823_v9 = vsub.f32 0.0, %v1822_v27  ;;  %v1835_v20 = vsel %vm1833_vm14, %v2444_v59, %v1834_v16 }
 0x1f1   :  { %v1812_v49 = vsub.f32 %v3792_v55, %v1811_v4  ;;  %v1815_v40 = vsub.f32 %v3794_v12, %v1811_v4  ;;  %v1836_v31 = vsel %vm1703_vm13, %v1835_v20, 0.0 }
 0x1f2   :  { %v1837_v60 = vrot.slane %v1836_v31, 4 }
 0x1f3   :  { %v1813_v25 = vmul.f32 1.442695, %v1812_v49  ;;  %v1816_v53 = vmul.f32 1.442695, %v1815_v40 }
 0x1f4   :  { %v1838_v12 = vadd.f32 %v1837_v60, %v1836_v31 }
 0x1f5   :  { %2609 = vpow2.f32 %v1813_v25 }
 0x1f6   :  { %2611 = vpow2.f32 %v1816_v53  ;;  %v1839_v40 = vrot.slane %v1838_v12, 2 }
 0x1f7   :  { %2613 = vpow2.f32 %v1697_v17 }
 0x1fb   :  { %v2610_v7 = vpop.eup %2609 }
 0x1fc   :  { %v2612_v35 = vpop.eup %2611 }
 0x1fd   :  { %v1818_v36 = vadd.f32 %v2612_v35, %v2610_v7  ;;  %v2614_v26 = vpop.eup %2613  ;;  %v1840_v35 = vadd.f32 %v1839_v40, %v1838_v12 }
 0x1fe   :  { %v1699_v52 = vadd.f32 1.0, %v2614_v26 }
 0x1ff   :  { %2615 = vlog2.f32 %v1818_v36 }
 0x200   :  { %2617 = vlog2.f32 %v1699_v52  ;;  %v1841_v52 = vrot.slane %v1840_v35, 1 }
 0x205   :  { %v2616_v33 = vpop.eup %2615 }
 0x206   :  { %v1820_v54 = vmul.f32 0.6931472, %v2616_v33  ;;  %v2618_v29 = vpop.eup %2617  ;;  %v1842_v33 = vadd.f32 %v1841_v52, %v1840_v35 }
 0x207   :  { %v1701_v38 = vmul.f32 0.6931472, %v2618_v29 }
 0x208   :  { %v1821_v45 = vadd.f32 %v1820_v54, %v1811_v4 }
 0x209   :  { %v1702_v37 = vadd.f32 %v1701_v38, %v1694_v57 }
 0x20a   :  { %v1824_v42 = vadd.f32 %v1823_v9, %v1821_v45 }
 0x20b   :  { %v1704_v13 = vsel %vm1703_vm13, %v1702_v37, 0.0 }
 0x20c   :  { %v1825_v47 = vsel %vm1703_vm13, %v1824_v42, 0.0  ;;  %v1705_v11 = vrot.slane %v1704_v13, 4 }
 0x20d   :  { %v1826_v23 = vrot.slane %v1825_v47, 4 }
 0x20e   :  { %v1671_v32 = vpop.f32.mrf.mxu0  ;;  %v1706_v58 = vadd.f32 %v1705_v11, %v1704_v13 }
 0x20f   :  { %v1672_v61 = vadd.f32 %v1671_v32, %v1652_v44  ;;  %v1827_v6 = vadd.f32 %v1826_v23, %v1825_v47 }
 0x210   :  { %v1707_v30 = vrot.slane %v1706_v58, 2 }
 0x211   :  { %v1828_v14 = vrot.slane %v1827_v6, 2 }
 0x212   :  { %v1708_v62 = vadd.f32 %v1707_v30, %v1706_v58 }
 0x213   :  { %v1829_v49 = vadd.f32 %v1828_v14, %v1827_v6 }
 0x214   :  { %v1709_v46 = vrot.slane %v1708_v62, 1 }
 0x215   :  { %v1830_v17 = vrot.slane %v1829_v49, 1 }
 0x216   :  { %v1710_v36 = vadd.f32 %v1709_v46, %v1708_v62 }
 0x217   :  { %v1831_v32 = vadd.f32 %v1830_v17, %v1829_v49 }
 0x236   :  { %v1691_v51 = vpop.f32.mrf.mxu1 }
 0x237   :  { %v1692_v19 = vadd.f32 %v1691_v51, %v1672_v61 }
 0x239   :  { %v1711_v21 = vsub.f32 0.0, %v1692_v19 }
 0x23b   :  { %v1713_v50 = vand.u32 2147483647, %v1711_v21  ;;  %v1712_v39 = vmax.f32 %v1711_v21, 0.0 }
 0x23d   :  { %v1714_v3 = vsub.f32 0.0, %v1713_v50 }
 0x23f   :  { %v1715_v63 = vmul.f32 1.442695, %v1714_v3 }
 0x241   :  { %2619 = vpow2.f32 %v1715_v63 }
 0x242   :  { %2621 = vrcp.f32 %v2671_v43 }
 0x247   :  { %v2620_v0 = vpop.eup %2619 }
 0x248   :  { %v1717_v1 = vadd.f32 1.0, %v2620_v0  ;;  %v2622_v34 = vpop.eup %2621 }
 0x249   :  { %v1730_v15 = vmul.f32 8.0, %v2622_v34  ;;  %vm1734_vm15 = vweird.f32 %v2622_v34 }
 0x24a   :  { %2623 = vlog2.f32 %v1717_v1 }
 0x24b   :  { %v1731_v24 = vsub.f32 1.0, %v1730_v15 }
 0x24d   :  { %v1732_v25 = vmul.f32 %v2622_v34, %v1731_v24 }
 0x24f   :  { %v1733_v10 = vadd.f32 %v2622_v34, %v1732_v25 }
 0x250   :  { %v2624_v2 = vpop.eup %2623 }
 0x251   :  { %v1719_v28 = vmul.f32 0.6931472, %v2624_v2  ;;  %v1735_v61 = vsel %vm1734_vm15, %v2622_v34, %v1733_v10 }
 0x252   :  { %v1832_v19 = vmul.f32 %v1831_v32, %v1735_v61  ;;  %v1843_v5 = vmul.f32 %v1842_v33, %v1735_v61 }
 0x253   :  { %v1720_v41 = vadd.f32 %v1719_v28, %v1712_v39 }
 0x254   :  { %v1844_v50 = vmul.f32 100.0, %v1843_v5 }
 0x255   :  { %v1721_v56 = vsel %vm1703_vm13, %v1720_v41, 0.0 }
 0x256   :  { %v1722_v55 = vrot.slane %v1721_v56, 4 }
 0x258   :  { %v1723_v4 = vadd.f32 %v1722_v55, %v1721_v56 }
 0x25a   :  { %v1724_v18 = vrot.slane %v1723_v4, 2 }
 0x25c   :  { %v1725_v53 = vadd.f32 %v1724_v18, %v1723_v4 }
 0x25e   :  { %v1726_v7 = vrot.slane %v1725_v53, 1 }
 0x260   :  { %v1727_v26 = vadd.f32 %v1726_v7, %v1725_v53 }
 0x262   :  { %v1728_v44 = vadd.f32 %v1727_v26, %v1710_v36 }
 0x264   :  { %v1736_v51 = vmul.f32 %v1735_v61, %v1728_v44 }
 0x266   :  { %v1845_v21 = vadd.f32 %v1832_v19, %v1736_v51 }
 0x268   :  { %1849 = vperm.xlu1 %2596, %v1845_v21  }
 0x270   :  { %1856 = vperm.xlu1 %2596, %v1844_v50  }
 0x2da   :  { %v1850_v22 = vpop.permute.xlu1 %1849 }
 0x2db   :  { %v1852_v54 = vsel %vm1846_vm0, %v1850_v22, 0.0 }
 0x2e2   :  { %v1857_v3 = vpop.permute.xlu1 %1856 }
 0x2e3   :  { %v1859_v29 = vsel %vm1853_vm1, %v1857_v3, 0.0 }
 0x2e4   :  { %v1860_v27 = vadd.f32 %v1859_v29, %v1852_v54 }
 0x2e6   :  { %1861 = vst [vmem:[%s3824_s9] sm:$0x1] %v1860_v27 }
 0x2e7   :  { %1866 = vsyncpa [#allocation6], 1 }

</bundles_post_ra>
